<compile_context>
chip_gen: v5e
topology: v5e:2x2
jax: 0.10.0
libtpu: 0.0.40
codegen_flags: <defaults>
</compile_context>

<pallas_src>
import jax
import jax.numpy as jnp
from jax import lax
from jax.experimental import pallas as pl
from jax.experimental.pallas import tpu as pltpu

# ----------------------------- config ---------------------------------------
BATCH = 2
SEQ = 8
INPUT = 32
HIDDEN = 32
OUTPUT = 4
VOCAB = 100

GATE_W = 128                 # per-gate lane width (HIDDEN=32 padded to a full lane group)
GATES_W = 4 * GATE_W         # 512: [i | f | g | o] blocks of 128 lanes each


# ----------------------------- kernel ---------------------------------------
def lstm_kernel(ids_ref, emb_ref, wih_ref, whh_ref, bias_ref, wlin_ref, blin_ref,
                y_ref, hs_ref, hc_ref,
                gx_ref, hacc_ref):
    """Embedding gather + full LSTM recurrence + output projection, single invocation.

    ids_ref : (SEQ*BATCH, 1)   int32 token ids, time-major rows (r = t*BATCH + b)
    emb_ref : (VOCAB, INPUT)   embedding table
    wih_ref : (INPUT, 4*128)   gate-padded, transposed weight_ih_l0
    whh_ref : (HIDDEN, 4*128)  gate-padded, transposed weight_hh_l0
    bias_ref: (1, 4*128)       gate-padded (b_ih + b_hh)
    wlin_ref: (128, OUTPUT)    zero-padded, transposed linear.weight
    blin_ref: (1, OUTPUT)
    y_ref   : (BATCH*SEQ, OUTPUT)  logits, already in batch-major .view() order
    hs_ref  : (1, BATCH, HIDDEN)   final hidden state
    hc_ref  : (1, BATCH, HIDDEN)   final cell state
    gx_ref  : (SEQ*BATCH, 4*128)   VMEM scratch: hoisted x-projection + bias
    hacc_ref: (BATCH*SEQ, 128)     VMEM scratch: per-step hidden states (batch-major)
    """
    # ---------------- preamble (off the serial critical path) ----------------
    # Fused embedding gather as a one-hot MXU matmul (exact: 1.0/0.0 weights).
    ids = ids_ref[...]                                                  # (SB, 1) int32
    onehot = (ids == lax.broadcasted_iota(jnp.int32, (SEQ * BATCH, VOCAB), 1)
              ).astype(jnp.float32)                                     # (SB, VOCAB)
    x_flat = jnp.dot(onehot, emb_ref[...],
                     preferred_element_type=jnp.float32)                # (SB, INPUT)
    # Hoisted input projection for all timesteps at once, bias folded in.
    gx_ref[...] = (jnp.dot(x_flat, wih_ref[...],
                           preferred_element_type=jnp.float32)
                   + bias_ref[...])                                     # (SB, 4*128)

    whh = whh_ref[...]                                                  # (HIDDEN, 4*128)

    # ---------------- fully-unrolled recurrence (static SEQ=8) ----------------
    h = jnp.zeros((BATCH, HIDDEN), jnp.float32)     # real lanes only (MXU K stays 32)
    c = jnp.zeros((BATCH, GATE_W), jnp.float32)     # padded; pad lanes stay exactly 0
    for t in range(SEQ):
        gates = (gx_ref[2 * t:2 * t + 2, :]
                 + jnp.dot(h, whh, preferred_element_type=jnp.float32))  # (BATCH, 4*128)
        # torch gate order i, f, g, o; each slice is a full, lane-aligned 128-wide block.
        i_g = jax.nn.sigmoid(gates[:, 0 * GATE_W:1 * GATE_W])
        f_g = jax.nn.sigmoid(gates[:, 1 * GATE_W:2 * GATE_W])
        g_g = jnp.tanh(gates[:, 2 * GATE_W:3 * GATE_W])
        o_g = jax.nn.sigmoid(gates[:, 3 * GATE_W:4 * GATE_W])
        c = f_g * c + i_g * g_g                                          # (BATCH, 128)
        h_full = o_g * jnp.tanh(c)                                       # (BATCH, 128)
        # Accumulate hidden states batch-major (row b*SEQ + t) so the final output
        # needs no transpose; stores are static, full-lane, off the recurrence chain.
        for b in range(BATCH):
            hacc_ref[b * SEQ + t:b * SEQ + t + 1, :] = h_full[b:b + 1, :]
        h = h_full[:, :HIDDEN]                                           # prefix slice

    # ---------------- epilogue: one output GEMM, one store ----------------
    y_ref[...] = (jnp.dot(hacc_ref[...], wlin_ref[...],
                          preferred_element_type=jnp.float32)
                  + blin_ref[...])                                       # (B*S, OUTPUT)
    hs_ref[0] = h
    hc_ref[0] = c[:, :HIDDEN]


# ----------------------------- wrapper ---------------------------------------
def lstm_forward(x_ids, kp):
    """Forward pass matching the PyTorch module.

    x_ids: (BATCH, SEQ) int32 token indices.
    kp   : kernel-layout (gate-padded) parameters from pack_params().
    Returns (output, h_s, h_c): output (BATCH*SEQ, OUTPUT), h_s/h_c (1, BATCH, HIDDEN).
    """
    # TODO(synk): caller-provided (_h_s, _h_c) initial states, LAYERS>1 and LSTM_BI=True
    #             variants of Config are not implemented (dropout is a no-op for 1 layer).
    ids_tm = x_ids.T.reshape(SEQ * BATCH, 1).astype(jnp.int32)   # time-major ids column

    vmem = pl.BlockSpec(memory_space=pltpu.MemorySpace.VMEM)
    output, h_s, h_c = pl.pallas_call(
        lstm_kernel,
        out_shape=(
            jax.ShapeDtypeStruct((BATCH * SEQ, OUTPUT), jnp.float32),
            jax.ShapeDtypeStruct((1, BATCH, HIDDEN), jnp.float32),
            jax.ShapeDtypeStruct((1, BATCH, HIDDEN), jnp.float32),
        ),
        in_specs=[vmem] * 7,
        out_specs=(vmem, vmem, vmem),
        scratch_shapes=[
            pltpu.VMEM((SEQ * BATCH, GATES_W), jnp.float32),   # gx: hoisted x-projection
            pltpu.VMEM((BATCH * SEQ, GATE_W), jnp.float32),    # hacc: hidden-state stack
        ],
    )(
        ids_tm,
        kp["emb"], kp["wih_pad"], kp["whh_pad"], kp["bias_pad"],
        kp["wlin_pad"], kp["blin"],
    )
    return output, h_s, h_c


# ----------------------------- params ----------------------------------------
def init_torch_params(key):
    """Torch-shaped parameters (weight_ih_l0: (4H, IN), weight_hh_l0: (4H, H), ...)."""
    ks = jax.random.split(key, 7)
    s = 1.0 / jnp.sqrt(HIDDEN)
    return {
        # "GloVe-like" pretrained embedding table (synthetic, deterministic).
        "embedding": jax.random.normal(ks[0], (VOCAB, INPUT), jnp.float32) * 0.1,
        "w_ih": jax.random.uniform(ks[1], (4 * HIDDEN, INPUT), jnp.float32, -s, s),
        "w_hh": jax.random.uniform(ks[2], (4 * HIDDEN, HIDDEN), jnp.float32, -s, s),
        "b_ih": jax.random.uniform(ks[3], (4 * HIDDEN,), jnp.float32, -s, s),
        "b_hh": jax.random.uniform(ks[4], (4 * HIDDEN,), jnp.float32, -s, s),
        "w_lin": jax.random.uniform(ks[5], (OUTPUT, HIDDEN), jnp.float32, -s, s),
        "b_lin": jax.random.uniform(ks[6], (OUTPUT,), jnp.float32, -s, s),
    }


def pack_params(tp):
    """Convert torch-layout params to the kernel's gate-padded (128 lanes/gate) layout."""
    H = HIDDEN
    wih = jnp.zeros((INPUT, 4, GATE_W), jnp.float32)
    whh = jnp.zeros((HIDDEN, 4, GATE_W), jnp.float32)
    bias = jnp.zeros((4, GATE_W), jnp.float32)
    for g in range(4):                                   # torch gate order: i, f, g, o
        wih = wih.at[:, g, :H].set(tp["w_ih"][g * H:(g + 1) * H, :].T)
        whh = whh.at[:, g, :H].set(tp["w_hh"][g * H:(g + 1) * H, :].T)
        bias = bias.at[g, :H].set(tp["b_ih"][g * H:(g + 1) * H]
                                  + tp["b_hh"][g * H:(g + 1) * H])
    wlin = jnp.zeros((GATE_W, OUTPUT), jnp.float32).at[:H, :].set(tp["w_lin"].T)
    return {
        "emb": tp["embedding"],
        "wih_pad": wih.reshape(INPUT, GATES_W),
        "whh_pad": whh.reshape(HIDDEN, GATES_W),
        "bias_pad": bias.reshape(1, GATES_W),
        "wlin_pad": wlin,
        "blin": tp["b_lin"].reshape(1, OUTPUT),
    }


# --------------------------- reference (pure JAX) ----------------------------
def lstm_forward_ref(x_ids, tp):
    H = HIDDEN
    x = tp["embedding"][x_ids]                          # (B, T, INPUT)
    wih_t, whh_t = tp["w_ih"].T, tp["w_hh"].T
    bias = tp["b_ih"] + tp["b_hh"]
    h = jnp.zeros((BATCH, H), jnp.float32)
    c = jnp.zeros((BATCH, H), jnp.float32)
    ys = []
    for t in range(SEQ):
        gates = x[:, t, :] @ wih_t + h @ whh_t + bias
        i_g = jax.nn.sigmoid(gates[:, 0 * H:1 * H])
        f_g = jax.nn.sigmoid(gates[:, 1 * H:2 * H])
        g_g = jnp.tanh(gates[:, 2 * H:3 * H])
        o_g = jax.nn.sigmoid(gates[:, 3 * H:4 * H])
        c = f_g * c + i_g * g_g
        h = o_g * jnp.tanh(c)
        ys.append(h @ tp["w_lin"].T + tp["b_lin"])
    r_out = jnp.stack(ys, axis=1)                       # (B, T, O)
    return r_out.reshape(BATCH * SEQ, OUTPUT), h[None], c[None]


# ------------------------------- main -----------------------------------------
if __name__ == "__main__":
    key = jax.random.PRNGKey(0)
    k_par, k_ids = jax.random.split(key)

    torch_params = init_torch_params(k_par)
    kernel_params = pack_params(torch_params)
    x_ids = jax.random.randint(k_ids, (BATCH, SEQ), 0, VOCAB, dtype=jnp.int32)

    fwd = jax.jit(lstm_forward)
    out, h_s, h_c = jax.block_until_ready(fwd(x_ids, kernel_params))

    out_r, hs_r, hc_r = lstm_forward_ref(x_ids, torch_params)
    assert out.shape == (BATCH * SEQ, OUTPUT)
    assert h_s.shape == (1, BATCH, HIDDEN) and h_c.shape == (1, BATCH, HIDDEN)
    assert jnp.allclose(out, out_r, atol=5e-5, rtol=5e-5)
    assert jnp.allclose(h_s, hs_r, atol=5e-5, rtol=5e-5)
    assert jnp.allclose(h_c, hc_r, atol=5e-5, rtol=5e-5)

    print("KERNEL_OK")
</pallas_src>

<mosaic_0001>
module attributes {stable_mosaic.version = 11 : i64} {
  func.func @lstm_kernel(%arg0: memref<16x1xi32, #tpu.memory_space<vmem>>, %arg1: memref<100x32xf32, #tpu.memory_space<vmem>>, %arg2: memref<32x512xf32, #tpu.memory_space<vmem>>, %arg3: memref<32x512xf32, #tpu.memory_space<vmem>>, %arg4: memref<1x512xf32, #tpu.memory_space<vmem>>, %arg5: memref<128x4xf32, #tpu.memory_space<vmem>>, %arg6: memref<1x4xf32, #tpu.memory_space<vmem>>, %arg7: memref<16x4xf32, #tpu.memory_space<vmem>>, %arg8: memref<1x2x32xf32, #tpu.memory_space<vmem>>, %arg9: memref<1x2x32xf32, #tpu.memory_space<vmem>>, %arg10: memref<16x512xf32, #tpu.memory_space<vmem>>, %arg11: memref<16x128xf32, #tpu.memory_space<vmem>>) attributes {dimension_semantics = [], scalar_prefetch = 0 : i64, scratch_operands = 2 : i64, tpu.core_type = #tpu.core_type<tc>} {
    %c0 = arith.constant 0 : index
    %c0_0 = arith.constant 0 : index
    %0 = vector.load %arg0[%c0, %c0_0] : memref<16x1xi32, #tpu.memory_space<vmem>>, vector<16x1xi32>
    %1 = tpu.iota {dimensions = array<i32: 1>} : vector<16x100xi32>
    %2 = vector.broadcast %0 : vector<16x1xi32> to vector<16x100xi32>
    %3 = arith.cmpi eq, %2, %1 : vector<16x100xi32>
    %4 = arith.extui %3 : vector<16x100xi1> to vector<16x100xi32>
    %5 = arith.sitofp %4 : vector<16x100xi32> to vector<16x100xf32>
    %c0_1 = arith.constant 0 : index
    %c0_2 = arith.constant 0 : index
    %6 = vector.load %arg1[%c0_1, %c0_2] : memref<100x32xf32, #tpu.memory_space<vmem>>, vector<100x32xf32>
    %cst = arith.constant dense<0.000000e+00> : vector<16x32xf32>
    %7 = tpu.matmul %5, %6, %cst {dimension_numbers = #tpu.dot_dimension_numbers<[1], [0], [0], [1], [0, 0, 1, 1], [], []>} : vector<16x100xf32>, vector<100x32xf32>, vector<16x32xf32> -> vector<16x32xf32>
    %c0_3 = arith.constant 0 : index
    %c0_4 = arith.constant 0 : index
    %8 = vector.load %arg2[%c0_3, %c0_4] : memref<32x512xf32, #tpu.memory_space<vmem>>, vector<32x512xf32>
    %cst_5 = arith.constant dense<0.000000e+00> : vector<16x512xf32>
    %9 = tpu.matmul %7, %8, %cst_5 {dimension_numbers = #tpu.dot_dimension_numbers<[1], [0], [0], [1], [0, 0, 1, 1], [], []>} : vector<16x32xf32>, vector<32x512xf32>, vector<16x512xf32> -> vector<16x512xf32>
    %c0_6 = arith.constant 0 : index
    %c0_7 = arith.constant 0 : index
    %10 = vector.load %arg4[%c0_6, %c0_7] : memref<1x512xf32, #tpu.memory_space<vmem>>, vector<1x512xf32>
    %11 = vector.broadcast %10 : vector<1x512xf32> to vector<16x512xf32>
    %12 = arith.addf %9, %11 : vector<16x512xf32>
    %c0_8 = arith.constant 0 : index
    %c0_9 = arith.constant 0 : index
    %13 = vector.load %arg10[%c0_8, %c0_9] : memref<16x512xf32, #tpu.memory_space<vmem>>, vector<16x512xf32>
    tpu.vector_store %arg10[%c0_8, %c0_9], %12 {strides = array<i32>} : memref<16x512xf32, #tpu.memory_space<vmem>>, vector<16x512xf32>,
    %c0_10 = arith.constant 0 : index
    %c0_11 = arith.constant 0 : index
    %14 = vector.load %arg3[%c0_10, %c0_11] : memref<32x512xf32, #tpu.memory_space<vmem>>, vector<32x512xf32>
    %cst_12 = arith.constant 0.000000e+00 : f32
    %15 = vector.broadcast %cst_12 : f32 to vector<2x32xf32>
    %cst_13 = arith.constant 0.000000e+00 : f32
    %16 = vector.broadcast %cst_13 : f32 to vector<2x128xf32>
    %c0_14 = arith.constant 0 : index
    %c0_15 = arith.constant 0 : index
    %17 = vector.load %arg10[%c0_14, %c0_15] : memref<16x512xf32, #tpu.memory_space<vmem>>, vector<2x512xf32>
    %cst_16 = arith.constant dense<0.000000e+00> : vector<2x512xf32>
    %18 = tpu.matmul %15, %14, %cst_16 {dimension_numbers = #tpu.dot_dimension_numbers<[1], [0], [0], [1], [0, 0, 1, 1], [], []>} : vector<2x32xf32>, vector<32x512xf32>, vector<2x512xf32> -> vector<2x512xf32>
    %19 = arith.addf %17, %18 : vector<2x512xf32>
    %20 = vector.extract_strided_slice %19 {offsets = [0, 0], sizes = [2, 128], strides = [1, 1]} : vector<2x512xf32> to vector<2x128xf32>
    %21 = arith.negf %20 : vector<2x128xf32>
    %22 = math.exp %21 : vector<2x128xf32>
    %cst_17 = arith.constant 1.000000e+00 : f32
    %23 = vector.broadcast %cst_17 : f32 to vector<2x128xf32>
    %24 = arith.addf %23, %22 : vector<2x128xf32>
    %25 = arith.divf %23, %24 : vector<2x128xf32>
    %26 = vector.extract_strided_slice %19 {offsets = [0, 128], sizes = [2, 128], strides = [1, 1]} : vector<2x512xf32> to vector<2x128xf32>
    %27 = arith.negf %26 : vector<2x128xf32>
    %28 = math.exp %27 : vector<2x128xf32>
    %cst_18 = arith.constant 1.000000e+00 : f32
    %29 = vector.broadcast %cst_18 : f32 to vector<2x128xf32>
    %30 = arith.addf %29, %28 : vector<2x128xf32>
    %31 = arith.divf %29, %30 : vector<2x128xf32>
    %32 = vector.extract_strided_slice %19 {offsets = [0, 256], sizes = [2, 128], strides = [1, 1]} : vector<2x512xf32> to vector<2x128xf32>
    %33 = math.tanh %32 : vector<2x128xf32>
    %34 = vector.extract_strided_slice %19 {offsets = [0, 384], sizes = [2, 128], strides = [1, 1]} : vector<2x512xf32> to vector<2x128xf32>
    %35 = arith.negf %34 : vector<2x128xf32>
    %36 = math.exp %35 : vector<2x128xf32>
    %cst_19 = arith.constant 1.000000e+00 : f32
    %37 = vector.broadcast %cst_19 : f32 to vector<2x128xf32>
    %38 = arith.addf %37, %36 : vector<2x128xf32>
    %39 = arith.divf %37, %38 : vector<2x128xf32>
    %40 = arith.mulf %31, %16 : vector<2x128xf32>
    %41 = arith.mulf %25, %33 : vector<2x128xf32>
    %42 = arith.addf %40, %41 : vector<2x128xf32>
    %43 = math.tanh %42 : vector<2x128xf32>
    %44 = arith.mulf %39, %43 : vector<2x128xf32>
    %45 = vector.extract_strided_slice %44 {offsets = [0, 0], sizes = [1, 128], strides = [1, 1]} : vector<2x128xf32> to vector<1x128xf32>
    %c0_20 = arith.constant 0 : index
    %c0_21 = arith.constant 0 : index
    %46 = vector.load %arg11[%c0_20, %c0_21] : memref<16x128xf32, #tpu.memory_space<vmem>>, vector<1x128xf32>
    tpu.vector_store %arg11[%c0_20, %c0_21], %45 {strides = array<i32>} : memref<16x128xf32, #tpu.memory_space<vmem>>, vector<1x128xf32>,
    %47 = vector.extract_strided_slice %44 {offsets = [1, 0], sizes = [1, 128], strides = [1, 1]} : vector<2x128xf32> to vector<1x128xf32>
    %c8 = arith.constant 8 : index
    %c0_22 = arith.constant 0 : index
    %48 = vector.load %arg11[%c8, %c0_22] : memref<16x128xf32, #tpu.memory_space<vmem>>, vector<1x128xf32>
    tpu.vector_store %arg11[%c8, %c0_22], %47 {strides = array<i32>} : memref<16x128xf32, #tpu.memory_space<vmem>>, vector<1x128xf32>,
    %49 = vector.extract_strided_slice %44 {offsets = [0, 0], sizes = [2, 32], strides = [1, 1]} : vector<2x128xf32> to vector<2x32xf32>
    %c2 = arith.constant 2 : index
    %c0_23 = arith.constant 0 : index
    %50 = vector.load %arg10[%c2, %c0_23] : memref<16x512xf32, #tpu.memory_space<vmem>>, vector<2x512xf32>
    %cst_24 = arith.constant dense<0.000000e+00> : vector<2x512xf32>
    %51 = tpu.matmul %49, %14, %cst_24 {dimension_numbers = #tpu.dot_dimension_numbers<[1], [0], [0], [1], [0, 0, 1, 1], [], []>} : vector<2x32xf32>, vector<32x512xf32>, vector<2x512xf32> -> vector<2x512xf32>
    %52 = arith.addf %50, %51 : vector<2x512xf32>
    %53 = vector.extract_strided_slice %52 {offsets = [0, 0], sizes = [2, 128], strides = [1, 1]} : vector<2x512xf32> to vector<2x128xf32>
    %54 = arith.negf %53 : vector<2x128xf32>
    %55 = math.exp %54 : vector<2x128xf32>
    %cst_25 = arith.constant 1.000000e+00 : f32
    %56 = vector.broadcast %cst_25 : f32 to vector<2x128xf32>
    %57 = arith.addf %56, %55 : vector<2x128xf32>
    %58 = arith.divf %56, %57 : vector<2x128xf32>
    %59 = vector.extract_strided_slice %52 {offsets = [0, 128], sizes = [2, 128], strides = [1, 1]} : vector<2x512xf32> to vector<2x128xf32>
    %60 = arith.negf %59 : vector<2x128xf32>
    %61 = math.exp %60 : vector<2x128xf32>
    %cst_26 = arith.constant 1.000000e+00 : f32
    %62 = vector.broadcast %cst_26 : f32 to vector<2x128xf32>
    %63 = arith.addf %62, %61 : vector<2x128xf32>
    %64 = arith.divf %62, %63 : vector<2x128xf32>
    %65 = vector.extract_strided_slice %52 {offsets = [0, 256], sizes = [2, 128], strides = [1, 1]} : vector<2x512xf32> to vector<2x128xf32>
    %66 = math.tanh %65 : vector<2x128xf32>
    %67 = vector.extract_strided_slice %52 {offsets = [0, 384], sizes = [2, 128], strides = [1, 1]} : vector<2x512xf32> to vector<2x128xf32>
    %68 = arith.negf %67 : vector<2x128xf32>
    %69 = math.exp %68 : vector<2x128xf32>
    %cst_27 = arith.constant 1.000000e+00 : f32
    %70 = vector.broadcast %cst_27 : f32 to vector<2x128xf32>
    %71 = arith.addf %70, %69 : vector<2x128xf32>
    %72 = arith.divf %70, %71 : vector<2x128xf32>
    %73 = arith.mulf %64, %42 : vector<2x128xf32>
    %74 = arith.mulf %58, %66 : vector<2x128xf32>
    %75 = arith.addf %73, %74 : vector<2x128xf32>
    %76 = math.tanh %75 : vector<2x128xf32>
    %77 = arith.mulf %72, %76 : vector<2x128xf32>
    %78 = vector.extract_strided_slice %77 {offsets = [0, 0], sizes = [1, 128], strides = [1, 1]} : vector<2x128xf32> to vector<1x128xf32>
    %c1 = arith.constant 1 : index
    %c0_28 = arith.constant 0 : index
    %79 = vector.load %arg11[%c1, %c0_28] : memref<16x128xf32, #tpu.memory_space<vmem>>, vector<1x128xf32>
    tpu.vector_store %arg11[%c1, %c0_28], %78 {strides = array<i32>} : memref<16x128xf32, #tpu.memory_space<vmem>>, vector<1x128xf32>,
    %80 = vector.extract_strided_slice %77 {offsets = [1, 0], sizes = [1, 128], strides = [1, 1]} : vector<2x128xf32> to vector<1x128xf32>
    %c9 = arith.constant 9 : index
    %c0_29 = arith.constant 0 : index
    %81 = vector.load %arg11[%c9, %c0_29] : memref<16x128xf32, #tpu.memory_space<vmem>>, vector<1x128xf32>
    tpu.vector_store %arg11[%c9, %c0_29], %80 {strides = array<i32>} : memref<16x128xf32, #tpu.memory_space<vmem>>, vector<1x128xf32>,
    %82 = vector.extract_strided_slice %77 {offsets = [0, 0], sizes = [2, 32], strides = [1, 1]} : vector<2x128xf32> to vector<2x32xf32>
    %c4 = arith.constant 4 : index
    %c0_30 = arith.constant 0 : index
    %83 = vector.load %arg10[%c4, %c0_30] : memref<16x512xf32, #tpu.memory_space<vmem>>, vector<2x512xf32>
    %cst_31 = arith.constant dense<0.000000e+00> : vector<2x512xf32>
    %84 = tpu.matmul %82, %14, %cst_31 {dimension_numbers = #tpu.dot_dimension_numbers<[1], [0], [0], [1], [0, 0, 1, 1], [], []>} : vector<2x32xf32>, vector<32x512xf32>, vector<2x512xf32> -> vector<2x512xf32>
    %85 = arith.addf %83, %84 : vector<2x512xf32>
    %86 = vector.extract_strided_slice %85 {offsets = [0, 0], sizes = [2, 128], strides = [1, 1]} : vector<2x512xf32> to vector<2x128xf32>
    %87 = arith.negf %86 : vector<2x128xf32>
    %88 = math.exp %87 : vector<2x128xf32>
    %cst_32 = arith.constant 1.000000e+00 : f32
    %89 = vector.broadcast %cst_32 : f32 to vector<2x128xf32>
    %90 = arith.addf %89, %88 : vector<2x128xf32>
    %91 = arith.divf %89, %90 : vector<2x128xf32>
    %92 = vector.extract_strided_slice %85 {offsets = [0, 128], sizes = [2, 128], strides = [1, 1]} : vector<2x512xf32> to vector<2x128xf32>
    %93 = arith.negf %92 : vector<2x128xf32>
    %94 = math.exp %93 : vector<2x128xf32>
    %cst_33 = arith.constant 1.000000e+00 : f32
    %95 = vector.broadcast %cst_33 : f32 to vector<2x128xf32>
    %96 = arith.addf %95, %94 : vector<2x128xf32>
    %97 = arith.divf %95, %96 : vector<2x128xf32>
    %98 = vector.extract_strided_slice %85 {offsets = [0, 256], sizes = [2, 128], strides = [1, 1]} : vector<2x512xf32> to vector<2x128xf32>
    %99 = math.tanh %98 : vector<2x128xf32>
    %100 = vector.extract_strided_slice %85 {offsets = [0, 384], sizes = [2, 128], strides = [1, 1]} : vector<2x512xf32> to vector<2x128xf32>
    %101 = arith.negf %100 : vector<2x128xf32>
    %102 = math.exp %101 : vector<2x128xf32>
    %cst_34 = arith.constant 1.000000e+00 : f32
    %103 = vector.broadcast %cst_34 : f32 to vector<2x128xf32>
    %104 = arith.addf %103, %102 : vector<2x128xf32>
    %105 = arith.divf %103, %104 : vector<2x128xf32>
    %106 = arith.mulf %97, %75 : vector<2x128xf32>
    %107 = arith.mulf %91, %99 : vector<2x128xf32>
    %108 = arith.addf %106, %107 : vector<2x128xf32>
    %109 = math.tanh %108 : vector<2x128xf32>
    %110 = arith.mulf %105, %109 : vector<2x128xf32>
    %111 = vector.extract_strided_slice %110 {offsets = [0, 0], sizes = [1, 128], strides = [1, 1]} : vector<2x128xf32> to vector<1x128xf32>
    %c2_35 = arith.constant 2 : index
    %c0_36 = arith.constant 0 : index
    %112 = vector.load %arg11[%c2_35, %c0_36] : memref<16x128xf32, #tpu.memory_space<vmem>>, vector<1x128xf32>
    tpu.vector_store %arg11[%c2_35, %c0_36], %111 {strides = array<i32>} : memref<16x128xf32, #tpu.memory_space<vmem>>, vector<1x128xf32>,
    %113 = vector.extract_strided_slice %110 {offsets = [1, 0], sizes = [1, 128], strides = [1, 1]} : vector<2x128xf32> to vector<1x128xf32>
    %c10 = arith.constant 10 : index
    %c0_37 = arith.constant 0 : index
    %114 = vector.load %arg11[%c10, %c0_37] : memref<16x128xf32, #tpu.memory_space<vmem>>, vector<1x128xf32>
    tpu.vector_store %arg11[%c10, %c0_37], %113 {strides = array<i32>} : memref<16x128xf32, #tpu.memory_space<vmem>>, vector<1x128xf32>,
    %115 = vector.extract_strided_slice %110 {offsets = [0, 0], sizes = [2, 32], strides = [1, 1]} : vector<2x128xf32> to vector<2x32xf32>
    %c6 = arith.constant 6 : index
    %c0_38 = arith.constant 0 : index
    %116 = vector.load %arg10[%c6, %c0_38] : memref<16x512xf32, #tpu.memory_space<vmem>>, vector<2x512xf32>
    %cst_39 = arith.constant dense<0.000000e+00> : vector<2x512xf32>
    %117 = tpu.matmul %115, %14, %cst_39 {dimension_numbers = #tpu.dot_dimension_numbers<[1], [0], [0], [1], [0, 0, 1, 1], [], []>} : vector<2x32xf32>, vector<32x512xf32>, vector<2x512xf32> -> vector<2x512xf32>
    %118 = arith.addf %116, %117 : vector<2x512xf32>
    %119 = vector.extract_strided_slice %118 {offsets = [0, 0], sizes = [2, 128], strides = [1, 1]} : vector<2x512xf32> to vector<2x128xf32>
    %120 = arith.negf %119 : vector<2x128xf32>
    %121 = math.exp %120 : vector<2x128xf32>
    %cst_40 = arith.constant 1.000000e+00 : f32
    %122 = vector.broadcast %cst_40 : f32 to vector<2x128xf32>
    %123 = arith.addf %122, %121 : vector<2x128xf32>
    %124 = arith.divf %122, %123 : vector<2x128xf32>
    %125 = vector.extract_strided_slice %118 {offsets = [0, 128], sizes = [2, 128], strides = [1, 1]} : vector<2x512xf32> to vector<2x128xf32>
    %126 = arith.negf %125 : vector<2x128xf32>
    %127 = math.exp %126 : vector<2x128xf32>
    %cst_41 = arith.constant 1.000000e+00 : f32
    %128 = vector.broadcast %cst_41 : f32 to vector<2x128xf32>
    %129 = arith.addf %128, %127 : vector<2x128xf32>
    %130 = arith.divf %128, %129 : vector<2x128xf32>
    %131 = vector.extract_strided_slice %118 {offsets = [0, 256], sizes = [2, 128], strides = [1, 1]} : vector<2x512xf32> to vector<2x128xf32>
    %132 = math.tanh %131 : vector<2x128xf32>
    %133 = vector.extract_strided_slice %118 {offsets = [0, 384], sizes = [2, 128], strides = [1, 1]} : vector<2x512xf32> to vector<2x128xf32>
    %134 = arith.negf %133 : vector<2x128xf32>
    %135 = math.exp %134 : vector<2x128xf32>
    %cst_42 = arith.constant 1.000000e+00 : f32
    %136 = vector.broadcast %cst_42 : f32 to vector<2x128xf32>
    %137 = arith.addf %136, %135 : vector<2x128xf32>
    %138 = arith.divf %136, %137 : vector<2x128xf32>
    %139 = arith.mulf %130, %108 : vector<2x128xf32>
    %140 = arith.mulf %124, %132 : vector<2x128xf32>
    %141 = arith.addf %139, %140 : vector<2x128xf32>
    %142 = math.tanh %141 : vector<2x128xf32>
    %143 = arith.mulf %138, %142 : vector<2x128xf32>
    %144 = vector.extract_strided_slice %143 {offsets = [0, 0], sizes = [1, 128], strides = [1, 1]} : vector<2x128xf32> to vector<1x128xf32>
    %c3 = arith.constant 3 : index
    %c0_43 = arith.constant 0 : index
    %145 = vector.load %arg11[%c3, %c0_43] : memref<16x128xf32, #tpu.memory_space<vmem>>, vector<1x128xf32>
    tpu.vector_store %arg11[%c3, %c0_43], %144 {strides = array<i32>} : memref<16x128xf32, #tpu.memory_space<vmem>>, vector<1x128xf32>,
    %146 = vector.extract_strided_slice %143 {offsets = [1, 0], sizes = [1, 128], strides = [1, 1]} : vector<2x128xf32> to vector<1x128xf32>
    %c11 = arith.constant 11 : index
    %c0_44 = arith.constant 0 : index
    %147 = vector.load %arg11[%c11, %c0_44] : memref<16x128xf32, #tpu.memory_space<vmem>>, vector<1x128xf32>
    tpu.vector_store %arg11[%c11, %c0_44], %146 {strides = array<i32>} : memref<16x128xf32, #tpu.memory_space<vmem>>, vector<1x128xf32>,
    %148 = vector.extract_strided_slice %143 {offsets = [0, 0], sizes = [2, 32], strides = [1, 1]} : vector<2x128xf32> to vector<2x32xf32>
    %c8_45 = arith.constant 8 : index
    %c0_46 = arith.constant 0 : index
    %149 = vector.load %arg10[%c8_45, %c0_46] : memref<16x512xf32, #tpu.memory_space<vmem>>, vector<2x512xf32>
    %cst_47 = arith.constant dense<0.000000e+00> : vector<2x512xf32>
    %150 = tpu.matmul %148, %14, %cst_47 {dimension_numbers = #tpu.dot_dimension_numbers<[1], [0], [0], [1], [0, 0, 1, 1], [], []>} : vector<2x32xf32>, vector<32x512xf32>, vector<2x512xf32> -> vector<2x512xf32>
    %151 = arith.addf %149, %150 : vector<2x512xf32>
    %152 = vector.extract_strided_slice %151 {offsets = [0, 0], sizes = [2, 128], strides = [1, 1]} : vector<2x512xf32> to vector<2x128xf32>
    %153 = arith.negf %152 : vector<2x128xf32>
    %154 = math.exp %153 : vector<2x128xf32>
    %cst_48 = arith.constant 1.000000e+00 : f32
    %155 = vector.broadcast %cst_48 : f32 to vector<2x128xf32>
    %156 = arith.addf %155, %154 : vector<2x128xf32>
    %157 = arith.divf %155, %156 : vector<2x128xf32>
    %158 = vector.extract_strided_slice %151 {offsets = [0, 128], sizes = [2, 128], strides = [1, 1]} : vector<2x512xf32> to vector<2x128xf32>
    %159 = arith.negf %158 : vector<2x128xf32>
    %160 = math.exp %159 : vector<2x128xf32>
    %cst_49 = arith.constant 1.000000e+00 : f32
    %161 = vector.broadcast %cst_49 : f32 to vector<2x128xf32>
    %162 = arith.addf %161, %160 : vector<2x128xf32>
    %163 = arith.divf %161, %162 : vector<2x128xf32>
    %164 = vector.extract_strided_slice %151 {offsets = [0, 256], sizes = [2, 128], strides = [1, 1]} : vector<2x512xf32> to vector<2x128xf32>
    %165 = math.tanh %164 : vector<2x128xf32>
    %166 = vector.extract_strided_slice %151 {offsets = [0, 384], sizes = [2, 128], strides = [1, 1]} : vector<2x512xf32> to vector<2x128xf32>
    %167 = arith.negf %166 : vector<2x128xf32>
    %168 = math.exp %167 : vector<2x128xf32>
    %cst_50 = arith.constant 1.000000e+00 : f32
    %169 = vector.broadcast %cst_50 : f32 to vector<2x128xf32>
    %170 = arith.addf %169, %168 : vector<2x128xf32>
    %171 = arith.divf %169, %170 : vector<2x128xf32>
    %172 = arith.mulf %163, %141 : vector<2x128xf32>
    %173 = arith.mulf %157, %165 : vector<2x128xf32>
    %174 = arith.addf %172, %173 : vector<2x128xf32>
    %175 = math.tanh %174 : vector<2x128xf32>
    %176 = arith.mulf %171, %175 : vector<2x128xf32>
    %177 = vector.extract_strided_slice %176 {offsets = [0, 0], sizes = [1, 128], strides = [1, 1]} : vector<2x128xf32> to vector<1x128xf32>
    %c4_51 = arith.constant 4 : index
    %c0_52 = arith.constant 0 : index
    %178 = vector.load %arg11[%c4_51, %c0_52] : memref<16x128xf32, #tpu.memory_space<vmem>>, vector<1x128xf32>
    tpu.vector_store %arg11[%c4_51, %c0_52], %177 {strides = array<i32>} : memref<16x128xf32, #tpu.memory_space<vmem>>, vector<1x128xf32>,
    %179 = vector.extract_strided_slice %176 {offsets = [1, 0], sizes = [1, 128], strides = [1, 1]} : vector<2x128xf32> to vector<1x128xf32>
    %c12 = arith.constant 12 : index
    %c0_53 = arith.constant 0 : index
    %180 = vector.load %arg11[%c12, %c0_53] : memref<16x128xf32, #tpu.memory_space<vmem>>, vector<1x128xf32>
    tpu.vector_store %arg11[%c12, %c0_53], %179 {strides = array<i32>} : memref<16x128xf32, #tpu.memory_space<vmem>>, vector<1x128xf32>,
    %181 = vector.extract_strided_slice %176 {offsets = [0, 0], sizes = [2, 32], strides = [1, 1]} : vector<2x128xf32> to vector<2x32xf32>
    %c10_54 = arith.constant 10 : index
    %c0_55 = arith.constant 0 : index
    %182 = vector.load %arg10[%c10_54, %c0_55] : memref<16x512xf32, #tpu.memory_space<vmem>>, vector<2x512xf32>
    %cst_56 = arith.constant dense<0.000000e+00> : vector<2x512xf32>
    %183 = tpu.matmul %181, %14, %cst_56 {dimension_numbers = #tpu.dot_dimension_numbers<[1], [0], [0], [1], [0, 0, 1, 1], [], []>} : vector<2x32xf32>, vector<32x512xf32>, vector<2x512xf32> -> vector<2x512xf32>
    %184 = arith.addf %182, %183 : vector<2x512xf32>
    %185 = vector.extract_strided_slice %184 {offsets = [0, 0], sizes = [2, 128], strides = [1, 1]} : vector<2x512xf32> to vector<2x128xf32>
    %186 = arith.negf %185 : vector<2x128xf32>
    %187 = math.exp %186 : vector<2x128xf32>
    %cst_57 = arith.constant 1.000000e+00 : f32
    %188 = vector.broadcast %cst_57 : f32 to vector<2x128xf32>
    %189 = arith.addf %188, %187 : vector<2x128xf32>
    %190 = arith.divf %188, %189 : vector<2x128xf32>
    %191 = vector.extract_strided_slice %184 {offsets = [0, 128], sizes = [2, 128], strides = [1, 1]} : vector<2x512xf32> to vector<2x128xf32>
    %192 = arith.negf %191 : vector<2x128xf32>
    %193 = math.exp %192 : vector<2x128xf32>
    %cst_58 = arith.constant 1.000000e+00 : f32
    %194 = vector.broadcast %cst_58 : f32 to vector<2x128xf32>
    %195 = arith.addf %194, %193 : vector<2x128xf32>
    %196 = arith.divf %194, %195 : vector<2x128xf32>
    %197 = vector.extract_strided_slice %184 {offsets = [0, 256], sizes = [2, 128], strides = [1, 1]} : vector<2x512xf32> to vector<2x128xf32>
    %198 = math.tanh %197 : vector<2x128xf32>
    %199 = vector.extract_strided_slice %184 {offsets = [0, 384], sizes = [2, 128], strides = [1, 1]} : vector<2x512xf32> to vector<2x128xf32>
    %200 = arith.negf %199 : vector<2x128xf32>
    %201 = math.exp %200 : vector<2x128xf32>
    %cst_59 = arith.constant 1.000000e+00 : f32
    %202 = vector.broadcast %cst_59 : f32 to vector<2x128xf32>
    %203 = arith.addf %202, %201 : vector<2x128xf32>
    %204 = arith.divf %202, %203 : vector<2x128xf32>
    %205 = arith.mulf %196, %174 : vector<2x128xf32>
    %206 = arith.mulf %190, %198 : vector<2x128xf32>
    %207 = arith.addf %205, %206 : vector<2x128xf32>
    %208 = math.tanh %207 : vector<2x128xf32>
    %209 = arith.mulf %204, %208 : vector<2x128xf32>
    %210 = vector.extract_strided_slice %209 {offsets = [0, 0], sizes = [1, 128], strides = [1, 1]} : vector<2x128xf32> to vector<1x128xf32>
    %c5 = arith.constant 5 : index
    %c0_60 = arith.constant 0 : index
    %211 = vector.load %arg11[%c5, %c0_60] : memref<16x128xf32, #tpu.memory_space<vmem>>, vector<1x128xf32>
    tpu.vector_store %arg11[%c5, %c0_60], %210 {strides = array<i32>} : memref<16x128xf32, #tpu.memory_space<vmem>>, vector<1x128xf32>,
    %212 = vector.extract_strided_slice %209 {offsets = [1, 0], sizes = [1, 128], strides = [1, 1]} : vector<2x128xf32> to vector<1x128xf32>
    %c13 = arith.constant 13 : index
    %c0_61 = arith.constant 0 : index
    %213 = vector.load %arg11[%c13, %c0_61] : memref<16x128xf32, #tpu.memory_space<vmem>>, vector<1x128xf32>
    tpu.vector_store %arg11[%c13, %c0_61], %212 {strides = array<i32>} : memref<16x128xf32, #tpu.memory_space<vmem>>, vector<1x128xf32>,
    %214 = vector.extract_strided_slice %209 {offsets = [0, 0], sizes = [2, 32], strides = [1, 1]} : vector<2x128xf32> to vector<2x32xf32>
    %c12_62 = arith.constant 12 : index
    %c0_63 = arith.constant 0 : index
    %215 = vector.load %arg10[%c12_62, %c0_63] : memref<16x512xf32, #tpu.memory_space<vmem>>, vector<2x512xf32>
    %cst_64 = arith.constant dense<0.000000e+00> : vector<2x512xf32>
    %216 = tpu.matmul %214, %14, %cst_64 {dimension_numbers = #tpu.dot_dimension_numbers<[1], [0], [0], [1], [0, 0, 1, 1], [], []>} : vector<2x32xf32>, vector<32x512xf32>, vector<2x512xf32> -> vector<2x512xf32>
    %217 = arith.addf %215, %216 : vector<2x512xf32>
    %218 = vector.extract_strided_slice %217 {offsets = [0, 0], sizes = [2, 128], strides = [1, 1]} : vector<2x512xf32> to vector<2x128xf32>
    %219 = arith.negf %218 : vector<2x128xf32>
    %220 = math.exp %219 : vector<2x128xf32>
    %cst_65 = arith.constant 1.000000e+00 : f32
    %221 = vector.broadcast %cst_65 : f32 to vector<2x128xf32>
    %222 = arith.addf %221, %220 : vector<2x128xf32>
    %223 = arith.divf %221, %222 : vector<2x128xf32>
    %224 = vector.extract_strided_slice %217 {offsets = [0, 128], sizes = [2, 128], strides = [1, 1]} : vector<2x512xf32> to vector<2x128xf32>
    %225 = arith.negf %224 : vector<2x128xf32>
    %226 = math.exp %225 : vector<2x128xf32>
    %cst_66 = arith.constant 1.000000e+00 : f32
    %227 = vector.broadcast %cst_66 : f32 to vector<2x128xf32>
    %228 = arith.addf %227, %226 : vector<2x128xf32>
    %229 = arith.divf %227, %228 : vector<2x128xf32>
    %230 = vector.extract_strided_slice %217 {offsets = [0, 256], sizes = [2, 128], strides = [1, 1]} : vector<2x512xf32> to vector<2x128xf32>
    %231 = math.tanh %230 : vector<2x128xf32>
    %232 = vector.extract_strided_slice %217 {offsets = [0, 384], sizes = [2, 128], strides = [1, 1]} : vector<2x512xf32> to vector<2x128xf32>
    %233 = arith.negf %232 : vector<2x128xf32>
    %234 = math.exp %233 : vector<2x128xf32>
    %cst_67 = arith.constant 1.000000e+00 : f32
    %235 = vector.broadcast %cst_67 : f32 to vector<2x128xf32>
    %236 = arith.addf %235, %234 : vector<2x128xf32>
    %237 = arith.divf %235, %236 : vector<2x128xf32>
    %238 = arith.mulf %229, %207 : vector<2x128xf32>
    %239 = arith.mulf %223, %231 : vector<2x128xf32>
    %240 = arith.addf %238, %239 : vector<2x128xf32>
    %241 = math.tanh %240 : vector<2x128xf32>
    %242 = arith.mulf %237, %241 : vector<2x128xf32>
    %243 = vector.extract_strided_slice %242 {offsets = [0, 0], sizes = [1, 128], strides = [1, 1]} : vector<2x128xf32> to vector<1x128xf32>
    %c6_68 = arith.constant 6 : index
    %c0_69 = arith.constant 0 : index
    %244 = vector.load %arg11[%c6_68, %c0_69] : memref<16x128xf32, #tpu.memory_space<vmem>>, vector<1x128xf32>
    tpu.vector_store %arg11[%c6_68, %c0_69], %243 {strides = array<i32>} : memref<16x128xf32, #tpu.memory_space<vmem>>, vector<1x128xf32>,
    %245 = vector.extract_strided_slice %242 {offsets = [1, 0], sizes = [1, 128], strides = [1, 1]} : vector<2x128xf32> to vector<1x128xf32>
    %c14 = arith.constant 14 : index
    %c0_70 = arith.constant 0 : index
    %246 = vector.load %arg11[%c14, %c0_70] : memref<16x128xf32, #tpu.memory_space<vmem>>, vector<1x128xf32>
    tpu.vector_store %arg11[%c14, %c0_70], %245 {strides = array<i32>} : memref<16x128xf32, #tpu.memory_space<vmem>>, vector<1x128xf32>,
    %247 = vector.extract_strided_slice %242 {offsets = [0, 0], sizes = [2, 32], strides = [1, 1]} : vector<2x128xf32> to vector<2x32xf32>
    %c14_71 = arith.constant 14 : index
    %c0_72 = arith.constant 0 : index
    %248 = vector.load %arg10[%c14_71, %c0_72] : memref<16x512xf32, #tpu.memory_space<vmem>>, vector<2x512xf32>
    %cst_73 = arith.constant dense<0.000000e+00> : vector<2x512xf32>
    %249 = tpu.matmul %247, %14, %cst_73 {dimension_numbers = #tpu.dot_dimension_numbers<[1], [0], [0], [1], [0, 0, 1, 1], [], []>} : vector<2x32xf32>, vector<32x512xf32>, vector<2x512xf32> -> vector<2x512xf32>
    %250 = arith.addf %248, %249 : vector<2x512xf32>
    %251 = vector.extract_strided_slice %250 {offsets = [0, 0], sizes = [2, 128], strides = [1, 1]} : vector<2x512xf32> to vector<2x128xf32>
    %252 = arith.negf %251 : vector<2x128xf32>
    %253 = math.exp %252 : vector<2x128xf32>
    %cst_74 = arith.constant 1.000000e+00 : f32
    %254 = vector.broadcast %cst_74 : f32 to vector<2x128xf32>
    %255 = arith.addf %254, %253 : vector<2x128xf32>
    %256 = arith.divf %254, %255 : vector<2x128xf32>
    %257 = vector.extract_strided_slice %250 {offsets = [0, 128], sizes = [2, 128], strides = [1, 1]} : vector<2x512xf32> to vector<2x128xf32>
    %258 = arith.negf %257 : vector<2x128xf32>
    %259 = math.exp %258 : vector<2x128xf32>
    %cst_75 = arith.constant 1.000000e+00 : f32
    %260 = vector.broadcast %cst_75 : f32 to vector<2x128xf32>
    %261 = arith.addf %260, %259 : vector<2x128xf32>
    %262 = arith.divf %260, %261 : vector<2x128xf32>
    %263 = vector.extract_strided_slice %250 {offsets = [0, 256], sizes = [2, 128], strides = [1, 1]} : vector<2x512xf32> to vector<2x128xf32>
    %264 = math.tanh %263 : vector<2x128xf32>
    %265 = vector.extract_strided_slice %250 {offsets = [0, 384], sizes = [2, 128], strides = [1, 1]} : vector<2x512xf32> to vector<2x128xf32>
    %266 = arith.negf %265 : vector<2x128xf32>
    %267 = math.exp %266 : vector<2x128xf32>
    %cst_76 = arith.constant 1.000000e+00 : f32
    %268 = vector.broadcast %cst_76 : f32 to vector<2x128xf32>
    %269 = arith.addf %268, %267 : vector<2x128xf32>
    %270 = arith.divf %268, %269 : vector<2x128xf32>
    %271 = arith.mulf %262, %240 : vector<2x128xf32>
    %272 = arith.mulf %256, %264 : vector<2x128xf32>
    %273 = arith.addf %271, %272 : vector<2x128xf32>
    %274 = math.tanh %273 : vector<2x128xf32>
    %275 = arith.mulf %270, %274 : vector<2x128xf32>
    %276 = vector.extract_strided_slice %275 {offsets = [0, 0], sizes = [1, 128], strides = [1, 1]} : vector<2x128xf32> to vector<1x128xf32>
    %c7 = arith.constant 7 : index
    %c0_77 = arith.constant 0 : index
    %277 = vector.load %arg11[%c7, %c0_77] : memref<16x128xf32, #tpu.memory_space<vmem>>, vector<1x128xf32>
    tpu.vector_store %arg11[%c7, %c0_77], %276 {strides = array<i32>} : memref<16x128xf32, #tpu.memory_space<vmem>>, vector<1x128xf32>,
    %278 = vector.extract_strided_slice %275 {offsets = [1, 0], sizes = [1, 128], strides = [1, 1]} : vector<2x128xf32> to vector<1x128xf32>
    %c15 = arith.constant 15 : index
    %c0_78 = arith.constant 0 : index
    %279 = vector.load %arg11[%c15, %c0_78] : memref<16x128xf32, #tpu.memory_space<vmem>>, vector<1x128xf32>
    tpu.vector_store %arg11[%c15, %c0_78], %278 {strides = array<i32>} : memref<16x128xf32, #tpu.memory_space<vmem>>, vector<1x128xf32>,
    %280 = vector.extract_strided_slice %275 {offsets = [0, 0], sizes = [2, 32], strides = [1, 1]} : vector<2x128xf32> to vector<2x32xf32>
    %c0_79 = arith.constant 0 : index
    %c0_80 = arith.constant 0 : index
    %281 = vector.load %arg11[%c0_79, %c0_80] : memref<16x128xf32, #tpu.memory_space<vmem>>, vector<16x128xf32>
    %c0_81 = arith.constant 0 : index
    %c0_82 = arith.constant 0 : index
    %282 = vector.load %arg5[%c0_81, %c0_82] : memref<128x4xf32, #tpu.memory_space<vmem>>, vector<128x4xf32>
    %cst_83 = arith.constant dense<0.000000e+00> : vector<16x4xf32>
    %283 = tpu.matmul %281, %282, %cst_83 {dimension_numbers = #tpu.dot_dimension_numbers<[1], [0], [0], [1], [0, 0, 1, 1], [], []>} : vector<16x128xf32>, vector<128x4xf32>, vector<16x4xf32> -> vector<16x4xf32>
    %c0_84 = arith.constant 0 : index
    %c0_85 = arith.constant 0 : index
    %284 = vector.load %arg6[%c0_84, %c0_85] : memref<1x4xf32, #tpu.memory_space<vmem>>, vector<1x4xf32>
    %285 = vector.broadcast %284 : vector<1x4xf32> to vector<16x4xf32>
    %286 = arith.addf %283, %285 : vector<16x4xf32>
    %c0_86 = arith.constant 0 : index
    %c0_87 = arith.constant 0 : index
    %287 = vector.load %arg7[%c0_86, %c0_87] : memref<16x4xf32, #tpu.memory_space<vmem>>, vector<16x4xf32>
    tpu.vector_store %arg7[%c0_86, %c0_87], %286 {strides = array<i32>} : memref<16x4xf32, #tpu.memory_space<vmem>>, vector<16x4xf32>,
    %c0_88 = arith.constant 0 : index
    %c0_89 = arith.constant 0 : index
    %c0_90 = arith.constant 0 : index
    %288 = vector.load %arg8[%c0_88, %c0_89, %c0_90] : memref<1x2x32xf32, #tpu.memory_space<vmem>>, vector<1x2x32xf32>
    %289 = vector.shape_cast %288 : vector<1x2x32xf32> to vector<2x32xf32>
    %290 = vector.shape_cast %280 : vector<2x32xf32> to vector<1x2x32xf32>
    tpu.vector_store %arg8[%c0_88, %c0_89, %c0_90], %290 {strides = array<i32>} : memref<1x2x32xf32, #tpu.memory_space<vmem>>, vector<1x2x32xf32>,
    %291 = vector.extract_strided_slice %273 {offsets = [0, 0], sizes = [2, 32], strides = [1, 1]} : vector<2x128xf32> to vector<2x32xf32>
    %c0_91 = arith.constant 0 : index
    %c0_92 = arith.constant 0 : index
    %c0_93 = arith.constant 0 : index
    %292 = vector.load %arg9[%c0_91, %c0_92, %c0_93] : memref<1x2x32xf32, #tpu.memory_space<vmem>>, vector<1x2x32xf32>
    %293 = vector.shape_cast %292 : vector<1x2x32xf32> to vector<2x32xf32>
    %294 = vector.shape_cast %291 : vector<2x32xf32> to vector<1x2x32xf32>
    tpu.vector_store %arg9[%c0_91, %c0_92, %c0_93], %294 {strides = array<i32>} : memref<1x2x32xf32, #tpu.memory_space<vmem>>, vector<1x2x32xf32>,
    return
  }
}

</mosaic_0001>

<bundles_post_ra>
// kernel: lstm_forward.1
= control target key start
LH: loop header
LB: loop body
LE: loop exit
PB: predicated region body
PF: predicated region fallthrough
CT: control target
= control target key end

     0   :  { %15 = vsyncpa [#allocation5], 0  ;;  %vm67_vm0 = vcmask 1043456   ;;  %v1947_v2 = vmov 0   ;;  %s2482_s0 = inlined_call_operand.vmem [shape: s32[16,1], index: 0, kind: input, shape index: {}]   ;;  %s2483_s1 = inlined_call_operand.vmem [shape: f32[100,32], index: 1, kind: input, shape index: {}]   ;;  %s2484_s2 = inlined_call_operand.vmem [shape: f32[32,512], index: 2, kind: input, shape index: {}]   ;;  %s2485_s3 = inlined_call_operand.vmem [shape: f32[32,512], index: 3, kind: input, shape index: {}]   ;;  %s2486_s4 = inlined_call_operand.vmem [shape: f32[1,512], index: 4, kind: input, shape index: {}]   ;;  %s2487_s5 = inlined_call_operand.vmem [shape: f32[128,4], index: 5, kind: input, shape index: {}]   ;;  %s2488_s6 = inlined_call_operand.vmem [shape: f32[1,4], index: 6, kind: input, shape index: {}]   ;;  %s2489_s7 = inlined_call_operand.vmem [shape: f32[16,4], index: 7, kind: output, shape index: {0}]   ;;  %s2490_s8 = inlined_call_operand.hbm [shape: f32[1,2,32], index: 8, kind: output, shape index: {1}]   ;;  %s2491_s9 = inlined_call_operand.hbm [shape: f32[1,2,32], index: 9, kind: output, shape index: {2}]  }
   0x1   :  { %v31_v0 = vld [vmem:[%s2482_s0] sm:$0xff]  ;;  %1749 = vset.pattern.permute.xlu0 %v1947_v2  ;;  %v58_v3 = vld [vmem:[%s2483_s1 + $0x58] sm:$0xff]  ;;  %v57_v4 = vld [vmem:[%s2483_s1 + $0x50] sm:$0xff] }
   0x2   :  { %v59_v1 = vld [vmem:[%s2483_s1 + $0x60] sm:$0xf]  ;;  %36 = vperm.xlu0 %1749, %v31_v0   ;;  %v56_v5 = vld [vmem:[%s2483_s1 + $0x48] sm:$0xff] }
   0x3   :  { %1678 = vmatpush.msk.msra.mxu0 %vm67_vm0, %v59_v1 }
   0x5   :  { %75 = vmatpush.msra.mxu0 %v58_v3 }
   0x7   :  { %76 = vmatpush.msra.mxu0 %v57_v4 }
   0x8   :  { %16 = vsyncpa [#allocation7], 0  ;;  %v55_v6 = vld [vmem:[%s2483_s1 + $0x40] sm:$0xff]  ;;  %v32_v7 = vld [vmem:[%s2482_s0 + $0x8] sm:$0xff]  ;;  %v33_v22 = vlaneseq  ;;  %vm60_vm1 = vcmask 818176   ;;  %v1948_v25 = vmov 0.0  }
   0x9   :  { %77 = vmatpush.msra.mxu0 %v56_v5  ;;  %v54_v8 = vld [vmem:[%s2483_s1 + $0x38] sm:$0xff]  ;;  %v53_v9 = vld [vmem:[%s2483_s1 + $0x30] sm:$0xff]  ;;  %v52_v10 = vld [vmem:[%s2483_s1 + $0x28] sm:$0xff]  ;;  %vm120_vm4 = vcmask 261120   ;;  %s1649_s25 = sshll.u32 %s2490_s8, 4  ;;  %s1950_s26 = smov [#allocation6]   ;;  %s1650_s25 = int_to_ptr.hbm [resolvable:$true] %s1649_s25 }
   0xa   :  { %39 = vperm.xlu0 %1749, %v32_v7   ;;  %v51_v11 = vld [vmem:[%s2483_s1 + $0x20] sm:$0xff]  ;;  %v50_v12 = vld [vmem:[%s2483_s1 + $0x18] sm:$0xff]  ;;  %v49_v13 = vld [vmem:[%s2483_s1 + $0x10] sm:$0xff]  ;;  %v34_v23 = vand.u32 127, %v33_v22  ;;  %s1658_s27 = sshll.u32 %s1950_s26, 4  ;;  %s1660_s30 = sshll.u32 %s2491_s9, 4  ;;  %s1659_s27 = int_to_ptr.vmem [resolvable:$true] %s1658_s27  ;;  %s1661_s30 = int_to_ptr.hbm [resolvable:$true] %s1660_s30 }
   0xb   :  { %78 = vmatpush.msra.mxu0 %v55_v6  ;;  %v48_v14 = vld [vmem:[%s2483_s1 + $0x8] sm:$0xff]  ;;  %v47_v15 = vld [vmem:[%s2483_s1] sm:$0xff]  ;;  %v108_v17 = vld [vmem:[%s2484_s2 + $0x70] sm:$0xff] }
   0xc   :  { %v106_v16 = vld [vmem:[%s2484_s2 + $0x60] sm:$0xff]  ;;  %185 = vmatpush.msra.mxu3 %v108_v17  ;;  %v104_v19 = vld [vmem:[%s2484_s2 + $0x50] sm:$0xff]  ;;  %v109_v31 = vld [vmem:[%s2484_s2 + $0x78] sm:$0xff] }
   0xd   :  { %79 = vmatpush.msra.mxu0 %v54_v8  ;;  %v102_v18 = vld [vmem:[%s2484_s2 + $0x40] sm:$0xff]  ;;  %v100_v21 = vld [vmem:[%s2484_s2 + $0x30] sm:$0xff]  ;;  %1741 = vmatpush.msra.mxu2 %v106_v16  ;;  %v105_v32 = vld [vmem:[%s2484_s2 + $0x58] sm:$0xff] }
   0xe   :  { %v98_v20 = vld [vmem:[%s2484_s2 + $0x20] sm:$0xff]  ;;  %186 = vmatpush.msra.mxu3 %v104_v19  ;;  %v96_v30 = vld [vmem:[%s2484_s2 + $0x10] sm:$0xff]  ;;  %v107_v33 = vld [vmem:[%s2484_s2 + $0x68] sm:$0xff] }
   0xf   :  { %80 = vmatpush.msra.mxu0 %v53_v9  ;;  %1742 = vmatpush.msra.mxu2 %v102_v18  ;;  %v94_v29 = vld [vmem:[%s2484_s2] sm:$0xff]  ;;  %v101_v34 = vld [vmem:[%s2484_s2 + $0x38] sm:$0xff]  ;;  %v103_v35 = vld [vmem:[%s2484_s2 + $0x48] sm:$0xff] }
  0x10   :  { %187 = vmatpush.msra.mxu3 %v100_v21  ;;  %v97_v36 = vld [vmem:[%s2484_s2 + $0x18] sm:$0xff]  ;;  %v99_v37 = vld [vmem:[%s2484_s2 + $0x28] sm:$0xff]  ;;  %v2099_v39 = vld [vmem:[%s2485_s3 + $0x60] sm:$0xff] }
  0x11   :  { %81 = vmatpush.msra.mxu0 %v52_v10  ;;  %1743 = vmatpush.msra.mxu2 %v98_v20  ;;  %v95_v38 = vld [vmem:[%s2484_s2 + $0x8] sm:$0xff]  ;;  %v2105_v40 = vld [vmem:[%s2485_s3 + $0x40] sm:$0xff]  ;;  %v2137_v46 = vld [vmem:[%s2485_s3 + $0x78] sm:$0xff] }
  0x12   :  { %188 = vmatpush.msra.mxu3 %v96_v30  ;;  %418 = vmatpush.msra.mxu1 %v2099_v39  ;;  %v2111_v41 = vld [vmem:[%s2485_s3 + $0x20] sm:$0xff]  ;;  %v2124_v43 = vld [vmem:[%s2485_s3 + $0x68] sm:$0xff]  ;;  %v2149_v48 = vld [vmem:[%s2485_s3 + $0x58] sm:$0xff] }
  0x13   :  { %82 = vmatpush.msra.mxu0 %v51_v11  ;;  %1744 = vmatpush.msra.mxu2 %v94_v29  ;;  %v2117_v42 = vld [vmem:[%s2485_s3] sm:$0xff]  ;;  %v2132_v45 = vld [vmem:[%s2485_s3 + $0x48] sm:$0xff]  ;;  %v2162_v50 = vld [vmem:[%s2485_s3 + $0x38] sm:$0xff] }
  0x14   :  { %208 = vmatpush.msrb.mxu3 %v109_v31  ;;  %419 = vmatpush.msra.mxu1 %v2105_v40  ;;  %v2144_v47 = vld [vmem:[%s2485_s3 + $0x28] sm:$0xff]  ;;  %v2170_v51 = vld [vmem:[%s2485_s3 + $0x18] sm:$0xff]  ;;  %v2185_v53 = vld [vmem:[%s2485_s3 + $0x70] sm:$0xff] }
  0x15   :  { %83 = vmatpush.msra.mxu0 %v50_v12  ;;  %162 = vmatpush.msrb.mxu2 %v107_v33  ;;  %v2157_v49 = vld [vmem:[%s2485_s3 + $0x8] sm:$0xff]  ;;  %v2194_v54 = vld [vmem:[%s2485_s3 + $0x50] sm:$0xff]  ;;  %v110_v57 = vld [vmem:[%s2486_s4] sm:$0xf] }
  0x16   :  { %209 = vmatpush.msrb.mxu3 %v105_v32  ;;  %420 = vmatpush.msra.mxu1 %v2111_v41  ;;  %v2201_v55 = vld [vmem:[%s2485_s3 + $0x30] sm:$0xff]  ;;  %v112_v58 = vperm.slane %v110_v57, 0  ;;  %v114_v61 = vperm.slane %v110_v57, 2  ;;  %v113_v4 = vperm.slane %v110_v57, 1  ;;  %v115_v5 = vperm.slane %v110_v57, 3 }
  0x17   :  { %84 = vmatpush.msra.mxu0 %v49_v13  ;;  %163 = vmatpush.msrb.mxu2 %v103_v35  ;;  %v2208_v56 = vld [vmem:[%s2485_s3 + $0x10] sm:$0xff] }
  0x18   :  { %210 = vmatpush.msrb.mxu3 %v101_v34  ;;  %421 = vmatpush.msra.mxu1 %v2117_v42 }
  0x19   :  { %85 = vmatpush.msra.mxu0 %v48_v14  ;;  %164 = vmatpush.msrb.mxu2 %v99_v37 }
  0x1a   :  { %211 = vmatpush.msrb.mxu3 %v97_v36  ;;  %590 = vmatpush.msrb.mxu1 %v2099_v39 }
  0x1b   :  { %86 = vmatpush.msra.mxu0 %v47_v15  ;;  %165 = vmatpush.msrb.mxu2 %v95_v38 }
  0x1c   :  { %591 = vmatpush.msrb.mxu1 %v2105_v40 }
  0x1d   :  { %139 = vmatpush.msrb.mxu0 %v106_v16 }
  0x1e   :  { %592 = vmatpush.msrb.mxu1 %v2111_v41 }
  0x1f   :  { %140 = vmatpush.msrb.mxu0 %v102_v18 }
  0x20   :  { %593 = vmatpush.msrb.mxu1 %v2117_v42 }
  0x21   :  { %141 = vmatpush.msrb.mxu0 %v98_v20 }
  0x23   :  { %142 = vmatpush.msrb.mxu0 %v94_v29 }
  0x74   :  { %v37_v24 = vpop.permute.xlu0 %36 }
  0x75   :  { %vm41_vm2 = vcmp.eq.s32.totalorder %v37_v24, %v34_v23 }
  0x76   :  { %v1676_v26 = vsel %vm41_vm2, 1.0, %v1948_v25 }
  0x77   :  { %1679 = vmatmul.msk.f32.vlgmr.msra.gmra.mxu0 %vm60_vm1, %v1676_v26 }
  0x78   :  { %478 = vmatpush.msra.mxu0 %v2137_v46 }
  0x7a   :  { %479 = vmatpush.msra.mxu0 %v2149_v48 }
  0x7c   :  { %v40_v27 = vpop.permute.xlu0 %39  ;;  %480 = vmatpush.msra.mxu0 %v2162_v50 }
  0x7d   :  { %vm42_vm3 = vcmp.eq.s32.totalorder %v40_v27, %v34_v23 }
  0x7e   :  { %v1677_v28 = vsel %vm42_vm3, 1.0, %v1948_v25  ;;  %481 = vmatpush.msra.mxu0 %v2170_v51 }
  0x7f   :  { %1680 = vmatmul.msk.f32.gmra.mxu0 %vm60_vm1, %v1677_v28 }
  0xf4   :  { %v88_v44 = vpop.f32.mrf.mxu0 }
  0xf5   :  { %1681 = vmatmul.msk.f32.vlgmr.msrb.gmra.mxu0 %vm120_vm4, %v88_v44  ;;  %1685 = vmatmul.msk.f32.vlgmr.msra.gmra.mxu3 %vm120_vm4, %v88_v44 }
  0xf6   :  { %282 = vmatpush.msra.mxu3 %v2124_v43  ;;  %650 = vmatpush.msrb.mxu0 %v2137_v46 }
  0xf8   :  { %283 = vmatpush.msra.mxu3 %v2132_v45  ;;  %651 = vmatpush.msrb.mxu0 %v2149_v48 }
  0xfa   :  { %284 = vmatpush.msra.mxu3 %v2144_v47  ;;  %652 = vmatpush.msrb.mxu0 %v2162_v50 }
  0xfc   :  { %v91_v52 = vpop.f32.mrf.mxu0  ;;  %285 = vmatpush.msra.mxu3 %v2157_v49  ;;  %653 = vmatpush.msrb.mxu0 %v2170_v51 }
  0xfd   :  { %1682 = vmatmul.msk.f32.vlgmr.msra.gmra.mxu2 %vm120_vm4, %v91_v52  ;;  %1686 = vmatmul.msk.f32.gmra.mxu3 %vm120_vm4, %v91_v52 }
  0xfe   :  { %262 = vmatpush.msra.mxu2 %v2099_v39 }
 0x100   :  { %263 = vmatpush.msra.mxu2 %v2105_v40 }
 0x102   :  { %264 = vmatpush.msra.mxu2 %v2111_v41 }
 0x104   :  { %265 = vmatpush.msra.mxu2 %v2117_v42 }
 0x105   :  { %1683 = vmatmul.msk.f32.vlgmr.msrb.gmra.mxu2 %vm120_vm4, %v88_v44  ;;  %1687 = vmatmul.msk.f32.vlgmr.msrb.gmra.mxu3 %vm120_vm4, %v88_v44 }
 0x106   :  { %302 = vmatpush.msrb.mxu2 %v2185_v53  ;;  %322 = vmatpush.msrb.mxu3 %v2137_v46 }
 0x108   :  { %303 = vmatpush.msrb.mxu2 %v2194_v54  ;;  %323 = vmatpush.msrb.mxu3 %v2149_v48 }
 0x10a   :  { %304 = vmatpush.msrb.mxu2 %v2201_v55  ;;  %324 = vmatpush.msrb.mxu3 %v2162_v50 }
 0x10c   :  { %305 = vmatpush.msrb.mxu2 %v2208_v56  ;;  %325 = vmatpush.msrb.mxu3 %v2170_v51 }
 0x10d   :  { %1684 = vmatmul.msk.f32.gmra.mxu2 %vm120_vm4, %v91_v52  ;;  %1688 = vmatmul.msk.f32.gmra.mxu3 %vm120_vm4, %v91_v52 }
 0x115   :  { %266 = vmatmul.f32.vlgmr.msra.gmra.mxu2 %v1948_v25  ;;  %286 = vmatmul.f32.vlgmr.msra.gmra.mxu3 %v1948_v25 }
 0x116   :  { %438 = vmatpush.msra.mxu2 %v2124_v43  ;;  %458 = vmatpush.msra.mxu3 %v2185_v53 }
 0x118   :  { %439 = vmatpush.msra.mxu2 %v2132_v45  ;;  %459 = vmatpush.msra.mxu3 %v2194_v54 }
 0x11a   :  { %440 = vmatpush.msra.mxu2 %v2144_v47  ;;  %460 = vmatpush.msra.mxu3 %v2201_v55 }
 0x11c   :  { %441 = vmatpush.msra.mxu2 %v2157_v49  ;;  %461 = vmatpush.msra.mxu3 %v2208_v56 }
 0x11d   :  { %306 = vmatmul.f32.vlgmr.msrb.gmra.mxu2 %v1948_v25  ;;  %326 = vmatmul.f32.vlgmr.msrb.gmra.mxu3 %v1948_v25 }
 0x11e   :  { %610 = vmatpush.msrb.mxu2 %v2124_v43  ;;  %630 = vmatpush.msrb.mxu3 %v2185_v53 }
 0x120   :  { %611 = vmatpush.msrb.mxu2 %v2132_v45  ;;  %631 = vmatpush.msrb.mxu3 %v2194_v54 }
 0x122   :  { %612 = vmatpush.msrb.mxu2 %v2144_v47  ;;  %632 = vmatpush.msrb.mxu3 %v2201_v55 }
 0x124   :  { %613 = vmatpush.msrb.mxu2 %v2157_v49  ;;  %633 = vmatpush.msrb.mxu3 %v2208_v56 }
 0x172   :  { %v144_v59 = vpop.f32.mrf.mxu0 }
 0x173   :  { %v145_v60 = vadd.f32 %v144_v59, %v112_v58 }
 0x175   :  { %219 = vst [vmem:[#allocation2 + $0x30] sm:$0xff] %v145_v60 }
 0x178   :  { %v190_v62 = vpop.f32.mrf.mxu3 }
 0x179   :  { %v191_v63 = vadd.f32 %v190_v62, %v114_v61 }
 0x17b   :  { %221 = vst [vmem:[#allocation2 + $0x18] sm:$0xff] %v191_v63 }
 0x17c   :  { %v243_v14 = vld [vmem:[#allocation2 + $0x30] sm:$0x3] }
 0x180   :  { %v147_v0 = vpop.f32.mrf.mxu2  ;;  %v193_v1 = vpop.f32.mrf.mxu3 }
 0x181   :  { %v148_v2 = vadd.f32 %v147_v0, %v112_v58  ;;  %v194_v3 = vadd.f32 %v193_v1, %v114_v61 }
 0x182   :  { %v245_v32 = vld [vmem:[#allocation2 + $0x18] sm:$0x3] }
 0x183   :  { %223 = vst [vmem:[#allocation2 + $0x8] sm:$0xff] %v148_v2 }
 0x184   :  { %225 = vst [vmem:[#allocation2 + $0x28] sm:$0xff] %v194_v3 }
 0x188   :  { %v167_v6 = vpop.f32.mrf.mxu2  ;;  %v213_v7 = vpop.f32.mrf.mxu3 }
 0x189   :  { %v168_v8 = vadd.f32 %v167_v6, %v113_v4  ;;  %v214_v9 = vadd.f32 %v213_v7, %v115_v5 }
 0x18b   :  { %220 = vst [vmem:[#allocation2] sm:$0xff] %v168_v8 }
 0x18c   :  { %222 = vst [vmem:[#allocation2 + $0x10] sm:$0xff] %v214_v9 }
 0x190   :  { %v170_v10 = vpop.f32.mrf.mxu2  ;;  %v216_v11 = vpop.f32.mrf.mxu3 }
 0x191   :  { %v171_v12 = vadd.f32 %v170_v10, %v113_v4  ;;  %v217_v13 = vadd.f32 %v216_v11, %v115_v5 }
 0x192   :  { %v244_v16 = vld [vmem:[#allocation2] sm:$0x3] }
 0x193   :  { %224 = vst [vmem:[#allocation2 + $0x20] sm:$0xff] %v171_v12  ;;  %v246_v22 = vld [vmem:[#allocation2 + $0x10] sm:$0x3] }
 0x194   :  { %226 = vst [vmem:[#allocation2 + $0x38] sm:$0xff] %v217_v13 }
 0x198   :  { %v267_v15 = vpop.f32.mrf.mxu2  ;;  %v287_v17 = vpop.f32.mrf.mxu3 }
 0x199   :  { %v330_v18 = vadd.f32 %v267_v15, %v243_v14  ;;  %v331_v19 = vadd.f32 %v287_v17, %v244_v16 }
 0x19b   :  { %v1689_v20 = vmul.f32 -1.442695, %v330_v18  ;;  %v1690_v21 = vmul.f32 -1.442695, %v331_v19 }
 0x19d   :  { %1751 = vpow2.f32 %v1689_v20 }
 0x19e   :  { %1753 = vpow2.f32 %v1690_v21 }
 0x1a0   :  { %v327_v23 = vpop.f32.mrf.mxu3  ;;  %v307_v30 = vpop.f32.mrf.mxu2 }
 0x1a1   :  { %v333_v24 = vadd.f32 %v327_v23, %v246_v22  ;;  %v332_v34 = vadd.f32 %v307_v30, %v245_v32 }
 0x1a3   :  { %v1752_v25 = vpop.eup %1751  ;;  %v1691_v26 = vmul.f32 -1.442695, %v333_v24 }
 0x1a4   :  { %v1754_v27 = vpop.eup %1753  ;;  %v337_v28 = vadd.f32 1.0, %v1752_v25 }
 0x1a5   :  { %v356_v29 = vadd.f32 1.0, %v1754_v27  ;;  %1755 = vpow2.f32 %v1691_v26  ;;  %v399_v26 = vld [vmem:[#allocation2 + $0x30] sm:$0xc] }
 0x1a6   :  { %1757 = vrcp.f32 %v337_v28  ;;  %v349_v57 = vand.u32 2147483648, %v337_v28  ;;  %v347_v60 = vand.u32 2147483647, %v337_v28  ;;  %vm343_vm7 = vweird.f32 %v337_v28 }
 0x1a7   :  { %1759 = vrcp.f32 %v356_v29  ;;  %v368_v58 = vand.u32 2147483648, %v356_v29  ;;  %v366_v62 = vand.u32 2147483647, %v356_v29  ;;  %vm362_vm8 = vweird.f32 %v356_v29 }
 0x1a8   :  { %v350_v1 = vor.u32 1.1754944e-38, %v349_v57  ;;  %vm348_vm10 = vcmp.eq.f32.partialorder %v347_v60, 8.507059e+37 }
 0x1a9   :  { %v369_v3 = vor.u32 1.1754944e-38, %v368_v58  ;;  %vm367_vm12 = vcmp.eq.f32.partialorder %v366_v62, 8.507059e+37 }
 0x1ab   :  { %v1756_v31 = vpop.eup %1755 }
 0x1ac   :  { %v1758_v33 = vpop.eup %1757  ;;  %v376_v35 = vadd.f32 1.0, %v1756_v31 }
 0x1ad   :  { %v1760_v36 = vpop.eup %1759  ;;  %v339_v37 = vmul.f32 %v1758_v33, %v337_v28  ;;  %vm344_vm5 = vweird.f32 %v1758_v33 }
 0x1ae   :  { %v358_v38 = vmul.f32 %v1760_v36, %v356_v29  ;;  %1761 = vrcp.f32 %v376_v35  ;;  %vm363_vm6 = vweird.f32 %v1760_v36  ;;  %vm345_vm9 = vmor %vm343_vm7, %vm344_vm5  ;;  %v388_v16 = vand.u32 2147483648, %v376_v35  ;;  %v402_v29 = vld [vmem:[#allocation2 + $0x10] sm:$0xc] }
 0x1af   :  { %v340_v44 = vsub.f32 1.0, %v339_v37  ;;  %1763 = vtanh.f32 %v332_v34  ;;  %vm364_vm11 = vmor %vm362_vm8, %vm363_vm6  ;;  %vm382_vm14 = vweird.f32 %v376_v35  ;;  %v386_v17 = vand.u32 2147483647, %v376_v35 }
 0x1b0   :  { %v359_v52 = vsub.f32 1.0, %v358_v38  ;;  %v389_v19 = vor.u32 1.1754944e-38, %v388_v16 }
 0x1b1   :  { %v341_v59 = vmul.f32 %v1758_v33, %v340_v44  ;;  %vm387_vm0 = vcmp.eq.f32.partialorder %v386_v17, 8.507059e+37 }
 0x1b2   :  { %v360_v61 = vmul.f32 %v1760_v36, %v359_v52 }
 0x1b3   :  { %v342_v63 = vadd.f32 %v1758_v33, %v341_v59 }
 0x1b4   :  { %v1762_v0 = vpop.eup %1761  ;;  %v361_v2 = vadd.f32 %v1760_v36, %v360_v61 }
 0x1b5   :  { %v346_v4 = vsel %vm345_vm9, %v1758_v33, %v342_v63  ;;  %v378_v5 = vmul.f32 %v1762_v0, %v376_v35  ;;  %v1764_v6 = vpop.eup %1763  ;;  %vm383_vm13 = vweird.f32 %v1762_v0  ;;  %v400_v35 = vld [vmem:[#allocation2] sm:$0xc] }
 0x1b6   :  { %v351_v7 = vsel %vm348_vm10, %v350_v1, %v346_v4  ;;  %v365_v8 = vsel %vm364_vm11, %v1760_v36, %v361_v2  ;;  %vm384_vm15 = vmor %vm382_vm14, %vm383_vm13  ;;  %v401_v2 = vld [vmem:[#allocation2 + $0x18] sm:$0xc] }
 0x1b7   :  { %v370_v9 = vsel %vm367_vm12, %v369_v3, %v365_v8  ;;  %v393_v10 = vmul.f32 %v1764_v6, %v351_v7  ;;  %v379_v11 = vsub.f32 1.0, %v378_v5 }
 0x1b8   :  { %v392_v12 = vmul.f32 0.0, %v370_v9 }
 0x1b9   :  { %v380_v13 = vmul.f32 %v1762_v0, %v379_v11 }
 0x1ba   :  { %v2239_v14 = vadd.f32 %v393_v10, %v392_v12 }
 0x1bb   :  { %v381_v15 = vadd.f32 %v1762_v0, %v380_v13 }
 0x1bc   :  { %1765 = vtanh.f32 %v2239_v14 }
 0x1bd   :  { %v385_v18 = vsel %vm384_vm15, %v1762_v0, %v381_v15 }
 0x1be   :  { %v390_v21 = vsel %vm387_vm0, %v389_v19, %v385_v18 }
 0x1c2   :  { %v1766_v20 = vpop.eup %1765 }
 0x1c3   :  { %v396_v22 = vmul.f32 %v1766_v20, %v390_v21 }
 0x1c5   :  { %1692 = vmatmul.msk.f32.vlgmr.msra.gmra.mxu1 %vm120_vm4, %v396_v22  ;;  %397 = vst [vmem:[#allocation3] sm:$0x1] %v396_v22  ;;  %1693 = vmatmul.msk.f32.vlgmr.msra.gmra.mxu2 %vm120_vm4, %v396_v22 }
 0x1c6   :  { %398 = vst [vmem:[#allocation3 + $0x7] sm:$0x2] %v396_v22  ;;  %1694 = vmatmul.msk.f32.vlgmr.msra.gmra.mxu3 %vm120_vm4, %v396_v22  ;;  %1695 = vmatmul.msk.f32.vlgmr.msra.gmra.mxu0 %vm120_vm4, %v396_v22  ;;  %v561_v22 = vrot.slane %v2239_v14, 6 }
 0x1c7   :  { %782 = vmatpush.msra.mxu2 %v2124_v43  ;;  %762 = vmatpush.msra.mxu1 %v2099_v39 }
 0x1c8   :  { %802 = vmatpush.msra.mxu3 %v2185_v53  ;;  %822 = vmatpush.msra.mxu0 %v2137_v46 }
 0x1c9   :  { %783 = vmatpush.msra.mxu2 %v2132_v45  ;;  %763 = vmatpush.msra.mxu1 %v2105_v40 }
 0x1ca   :  { %803 = vmatpush.msra.mxu3 %v2194_v54  ;;  %823 = vmatpush.msra.mxu0 %v2149_v48 }
 0x1cb   :  { %784 = vmatpush.msra.mxu2 %v2144_v47  ;;  %764 = vmatpush.msra.mxu1 %v2111_v41 }
 0x1cc   :  { %804 = vmatpush.msra.mxu3 %v2201_v55  ;;  %824 = vmatpush.msra.mxu0 %v2162_v50 }
 0x1cd   :  { %785 = vmatpush.msra.mxu2 %v2157_v49  ;;  %765 = vmatpush.msra.mxu1 %v2117_v42 }
 0x1ce   :  { %805 = vmatpush.msra.mxu3 %v2208_v56  ;;  %825 = vmatpush.msra.mxu0 %v2170_v51 }
 0x242   :  { %v423_v23 = vpop.f32.mrf.mxu1 }
 0x243   :  { %v490_v24 = vrot.slane %v423_v23, 6  ;;  %v483_v25 = vpop.f32.mrf.mxu0 }
 0x244   :  { %v493_v27 = vrot.slane %v483_v25, 6 }
 0x245   :  { %v498_v28 = vadd.f32 %v490_v24, %v399_v26 }
 0x246   :  { %v501_v30 = vadd.f32 %v493_v27, %v402_v29 }
 0x247   :  { %v1696_v31 = vmul.f32 -1.442695, %v498_v28 }
 0x248   :  { %v1698_v32 = vmul.f32 -1.442695, %v501_v30  ;;  %v443_v33 = vpop.f32.mrf.mxu2 }
 0x249   :  { %1767 = vpow2.f32 %v1696_v31  ;;  %v491_v34 = vrot.slane %v443_v33, 6  ;;  %v463_v60 = vpop.f32.mrf.mxu3 }
 0x24a   :  { %1769 = vpow2.f32 %v1698_v32  ;;  %v492_v63 = vrot.slane %v463_v60, 6  ;;  %v573_v60 = vld [vmem:[#allocation2 + $0x10] sm:$0x30] }
 0x24b   :  { %v499_v36 = vadd.f32 %v491_v34, %v400_v35 }
 0x24c   :  { %v500_v5 = vadd.f32 %v492_v63, %v401_v2  ;;  %v571_v2 = vld [vmem:[#allocation2] sm:$0x30] }
 0x24d   :  { %v1697_v37 = vmul.f32 -1.442695, %v499_v36 }
 0x24f   :  { %v1768_v38 = vpop.eup %1767  ;;  %1771 = vpow2.f32 %v1697_v37 }
 0x250   :  { %v1770_v44 = vpop.eup %1769  ;;  %v505_v52 = vadd.f32 1.0, %v1768_v38 }
 0x251   :  { %v544_v57 = vadd.f32 1.0, %v1770_v44 }
 0x252   :  { %1773 = vrcp.f32 %v505_v52  ;;  %v517_v9 = vand.u32 2147483648, %v505_v52  ;;  %vm511_vm2 = vweird.f32 %v505_v52  ;;  %v515_v11 = vand.u32 2147483647, %v505_v52 }
 0x253   :  { %1775 = vrcp.f32 %v544_v57  ;;  %v556_v31 = vand.u32 2147483648, %v544_v57  ;;  %vm550_vm11 = vweird.f32 %v544_v57  ;;  %v554_v32 = vand.u32 2147483647, %v544_v57 }
 0x254   :  { %v518_v18 = vor.u32 1.1754944e-38, %v517_v9  ;;  %vm516_vm7 = vcmp.eq.f32.partialorder %v515_v11, 8.507059e+37 }
 0x255   :  { %v1772_v58 = vpop.eup %1771  ;;  %v557_v34 = vor.u32 1.1754944e-38, %v556_v31  ;;  %vm555_vm13 = vcmp.eq.f32.partialorder %v554_v32, 8.507059e+37 }
 0x256   :  { %v524_v59 = vadd.f32 1.0, %v1772_v58 }
 0x258   :  { %v1774_v61 = vpop.eup %1773  ;;  %1777 = vrcp.f32 %v524_v59  ;;  %v536_v12 = vand.u32 2147483648, %v524_v59  ;;  %v534_v16 = vand.u32 2147483647, %v524_v59  ;;  %vm530_vm6 = vweird.f32 %v524_v59 }
 0x259   :  { %v507_v62 = vmul.f32 %v1774_v61, %v505_v52  ;;  %v1776_v1 = vpop.eup %1775  ;;  %vm512_vm1 = vweird.f32 %v1774_v61  ;;  %1779 = vtanh.f32 %v500_v5 }
 0x25a   :  { %v546_v8 = vmul.f32 %v1776_v1, %v544_v57  ;;  %vm513_vm3 = vmor %vm511_vm2, %vm512_vm1  ;;  %v537_v20 = vor.u32 1.1754944e-38, %v536_v12  ;;  %vm535_vm9 = vcmp.eq.f32.partialorder %v534_v16, 8.507059e+37  ;;  %vm551_vm10 = vweird.f32 %v1776_v1  ;;  %v570_v57 = vld [vmem:[#allocation2 + $0x30] sm:$0x30] }
 0x25b   :  { %v508_v0 = vsub.f32 1.0, %v507_v62  ;;  %vm552_vm12 = vmor %vm550_vm11, %vm551_vm10 }
 0x25c   :  { %v547_v17 = vsub.f32 1.0, %v546_v8 }
 0x25d   :  { %v509_v3 = vmul.f32 %v1774_v61, %v508_v0 }
 0x25e   :  { %v1778_v4 = vpop.eup %1777  ;;  %v548_v25 = vmul.f32 %v1776_v1, %v547_v17 }
 0x25f   :  { %v526_v6 = vmul.f32 %v1778_v4, %v524_v59  ;;  %v510_v7 = vadd.f32 %v1774_v61, %v509_v3  ;;  %vm531_vm5 = vweird.f32 %v1778_v4  ;;  %v1780_v24 = vpop.eup %1779 }
 0x260   :  { %vm532_vm8 = vmor %vm530_vm6, %vm531_vm5  ;;  %v549_v30 = vadd.f32 %v1776_v1, %v548_v25 }
 0x261   :  { %v527_v10 = vsub.f32 1.0, %v526_v6  ;;  %v514_v15 = vsel %vm513_vm3, %v1774_v61, %v510_v7 }
 0x262   :  { %v519_v21 = vsel %vm516_vm7, %v518_v18, %v514_v15  ;;  %v553_v33 = vsel %vm552_vm12, %v1776_v1, %v549_v30  ;;  %v572_v18 = vld [vmem:[#allocation2 + $0x18] sm:$0x30] }
 0x263   :  { %v528_v13 = vmul.f32 %v1778_v4, %v527_v10  ;;  %v564_v28 = vmul.f32 %v1780_v24, %v519_v21  ;;  %v558_v35 = vsel %vm555_vm13, %v557_v34, %v553_v33 }
 0x265   :  { %v529_v19 = vadd.f32 %v1778_v4, %v528_v13 }
 0x267   :  { %v533_v23 = vsel %vm532_vm8, %v1778_v4, %v529_v19 }
 0x268   :  { %v538_v26 = vsel %vm535_vm9, %v537_v20, %v533_v23 }
 0x269   :  { %v563_v27 = vmul.f32 %v561_v22, %v538_v26 }
 0x26b   :  { %v2263_v29 = vadd.f32 %v564_v28, %v563_v27 }
 0x26d   :  { %1781 = vtanh.f32 %v2263_v29 }
 0x273   :  { %v1782_v14 = vpop.eup %1781 }
 0x274   :  { %v567_v36 = vmul.f32 %v1782_v14, %v558_v35 }
 0x276   :  { %568 = vst [vmem:[#allocation3 - $0x1] sm:$0x4] %v567_v36  ;;  %v575_v37 = vrot.slane %v567_v36, 2 }
 0x277   :  { %569 = vst [vmem:[#allocation3 + $0x6] sm:$0x8] %v567_v36 }
 0x278   :  { %1699 = vmatmul.msk.f32.vlgmr.msrb.gmra.mxu1 %vm120_vm4, %v575_v37  ;;  %1700 = vmatmul.msk.f32.vlgmr.msrb.gmra.mxu2 %vm120_vm4, %v575_v37 }
 0x279   :  { %1701 = vmatmul.msk.f32.vlgmr.msrb.gmra.mxu3 %vm120_vm4, %v575_v37  ;;  %1702 = vmatmul.msk.f32.vlgmr.msrb.gmra.mxu0 %vm120_vm4, %v575_v37  ;;  %v733_v37 = vrot.slane %v2263_v29, 6 }
 0x27a   :  { %954 = vmatpush.msrb.mxu2 %v2124_v43  ;;  %934 = vmatpush.msrb.mxu1 %v2099_v39 }
 0x27b   :  { %974 = vmatpush.msrb.mxu3 %v2185_v53  ;;  %994 = vmatpush.msrb.mxu0 %v2137_v46 }
 0x27c   :  { %955 = vmatpush.msrb.mxu2 %v2132_v45  ;;  %935 = vmatpush.msrb.mxu1 %v2105_v40 }
 0x27d   :  { %975 = vmatpush.msrb.mxu3 %v2194_v54  ;;  %995 = vmatpush.msrb.mxu0 %v2149_v48 }
 0x27e   :  { %956 = vmatpush.msrb.mxu2 %v2144_v47  ;;  %936 = vmatpush.msrb.mxu1 %v2111_v41 }
 0x27f   :  { %976 = vmatpush.msrb.mxu3 %v2201_v55  ;;  %996 = vmatpush.msrb.mxu0 %v2162_v50 }
 0x280   :  { %957 = vmatpush.msrb.mxu2 %v2157_v49  ;;  %937 = vmatpush.msrb.mxu1 %v2117_v42 }
 0x281   :  { %977 = vmatpush.msrb.mxu3 %v2208_v56  ;;  %997 = vmatpush.msrb.mxu0 %v2170_v51 }
 0x2f5   :  { %v595_v38 = vpop.f32.mrf.mxu1 }
 0x2f6   :  { %v662_v44 = vrot.slane %v595_v38, 4  ;;  %v655_v52 = vpop.f32.mrf.mxu0 }
 0x2f7   :  { %v665_v58 = vrot.slane %v655_v52, 4 }
 0x2f8   :  { %v670_v59 = vadd.f32 %v662_v44, %v570_v57 }
 0x2f9   :  { %v673_v61 = vadd.f32 %v665_v58, %v573_v60 }
 0x2fa   :  { %v1703_v62 = vmul.f32 -1.442695, %v670_v59 }
 0x2fb   :  { %v1705_v63 = vmul.f32 -1.442695, %v673_v61  ;;  %v615_v0 = vpop.f32.mrf.mxu2 }
 0x2fc   :  { %1783 = vpow2.f32 %v1703_v62  ;;  %v663_v1 = vrot.slane %v615_v0, 4  ;;  %v635_v11 = vpop.f32.mrf.mxu3 }
 0x2fd   :  { %1785 = vpow2.f32 %v1705_v63  ;;  %v664_v15 = vrot.slane %v635_v11, 4  ;;  %v745_v11 = vld [vmem:[#allocation2 + $0x10] sm:$0xc0] }
 0x2fe   :  { %v671_v3 = vadd.f32 %v663_v1, %v571_v2 }
 0x2ff   :  { %v672_v21 = vadd.f32 %v664_v15, %v572_v18  ;;  %v743_v18 = vld [vmem:[#allocation2] sm:$0xc0] }
 0x300   :  { %v1704_v4 = vmul.f32 -1.442695, %v671_v3 }
 0x302   :  { %v1784_v5 = vpop.eup %1783  ;;  %1787 = vpow2.f32 %v1704_v4 }
 0x303   :  { %v1786_v6 = vpop.eup %1785  ;;  %v677_v7 = vadd.f32 1.0, %v1784_v5 }
 0x304   :  { %v716_v8 = vadd.f32 1.0, %v1786_v6 }
 0x305   :  { %1789 = vrcp.f32 %v677_v7  ;;  %v689_v25 = vand.u32 2147483648, %v677_v7  ;;  %vm683_vm15 = vweird.f32 %v677_v7  ;;  %v687_v27 = vand.u32 2147483647, %v677_v7 }
 0x306   :  { %1791 = vrcp.f32 %v716_v8  ;;  %v728_v62 = vand.u32 2147483648, %v716_v8  ;;  %vm722_vm8 = vweird.f32 %v716_v8  ;;  %v726_v63 = vand.u32 2147483647, %v716_v8 }
 0x307   :  { %v690_v34 = vor.u32 1.1754944e-38, %v689_v25  ;;  %vm688_vm3 = vcmp.eq.f32.partialorder %v687_v27, 8.507059e+37 }
 0x308   :  { %v1788_v9 = vpop.eup %1787  ;;  %v729_v1 = vor.u32 1.1754944e-38, %v728_v62  ;;  %vm727_vm10 = vcmp.eq.f32.partialorder %v726_v63, 8.507059e+37 }
 0x309   :  { %v696_v10 = vadd.f32 1.0, %v1788_v9 }
 0x30b   :  { %v1790_v12 = vpop.eup %1789  ;;  %1793 = vrcp.f32 %v696_v10  ;;  %v708_v28 = vand.u32 2147483648, %v696_v10  ;;  %v706_v32 = vand.u32 2147483647, %v696_v10  ;;  %vm702_vm2 = vweird.f32 %v696_v10 }
 0x30c   :  { %v679_v13 = vmul.f32 %v1790_v12, %v677_v7  ;;  %v1792_v17 = vpop.eup %1791  ;;  %vm684_vm14 = vweird.f32 %v1790_v12  ;;  %1795 = vtanh.f32 %v672_v21 }
 0x30d   :  { %v718_v24 = vmul.f32 %v1792_v17, %v716_v8  ;;  %vm685_vm0 = vmor %vm683_vm15, %vm684_vm14  ;;  %v709_v35 = vor.u32 1.1754944e-38, %v708_v28  ;;  %vm707_vm6 = vcmp.eq.f32.partialorder %v706_v32, 8.507059e+37  ;;  %vm723_vm7 = vweird.f32 %v1792_v17  ;;  %v742_v8 = vld [vmem:[#allocation2 + $0x30] sm:$0xc0] }
 0x30e   :  { %v680_v16 = vsub.f32 1.0, %v679_v13  ;;  %vm724_vm9 = vmor %vm722_vm8, %vm723_vm7 }
 0x30f   :  { %v719_v33 = vsub.f32 1.0, %v718_v24 }
 0x310   :  { %v681_v19 = vmul.f32 %v1790_v12, %v680_v16 }
 0x311   :  { %v1794_v20 = vpop.eup %1793  ;;  %v720_v52 = vmul.f32 %v1792_v17, %v719_v33  ;;  %v744_v33 = vld [vmem:[#allocation2 + $0x18] sm:$0xc0] }
 0x312   :  { %v698_v22 = vmul.f32 %v1794_v20, %v696_v10  ;;  %v682_v23 = vadd.f32 %v1790_v12, %v681_v19  ;;  %vm703_vm1 = vweird.f32 %v1794_v20  ;;  %v1796_v44 = vpop.eup %1795 }
 0x313   :  { %vm704_vm5 = vmor %vm702_vm2, %vm703_vm1  ;;  %v721_v61 = vadd.f32 %v1792_v17, %v720_v52 }
 0x314   :  { %v699_v26 = vsub.f32 1.0, %v698_v22  ;;  %v686_v31 = vsel %vm685_vm0, %v1790_v12, %v682_v23 }
 0x315   :  { %v691_v36 = vsel %vm688_vm3, %v690_v34, %v686_v31  ;;  %v725_v0 = vsel %vm724_vm9, %v1792_v17, %v721_v61 }
 0x316   :  { %v700_v30 = vmul.f32 %v1794_v20, %v699_v26  ;;  %v736_v59 = vmul.f32 %v1796_v44, %v691_v36  ;;  %v730_v2 = vsel %vm727_vm10, %v729_v1, %v725_v0 }
 0x318   :  { %v701_v14 = vadd.f32 %v1794_v20, %v700_v30 }
 0x31a   :  { %v705_v38 = vsel %vm704_vm5, %v1794_v20, %v701_v14 }
 0x31b   :  { %v710_v57 = vsel %vm707_vm6, %v709_v35, %v705_v38 }
 0x31c   :  { %v735_v58 = vmul.f32 %v733_v37, %v710_v57 }
 0x31e   :  { %v2287_v60 = vadd.f32 %v736_v59, %v735_v58 }
 0x320   :  { %1797 = vtanh.f32 %v2287_v60 }
 0x326   :  { %v1798_v29 = vpop.eup %1797 }
 0x327   :  { %v739_v3 = vmul.f32 %v1798_v29, %v730_v2 }
 0x329   :  { %740 = vst [vmem:[#allocation3 - $0x2] sm:$0x10] %v739_v3  ;;  %v747_v4 = vrot.slane %v739_v3, 4 }
 0x32a   :  { %741 = vst [vmem:[#allocation3 + $0x5] sm:$0x20] %v739_v3  ;;  %v905_v3 = vrot.slane %v2287_v60, 6 }
 0x32b   :  { %1706 = vmatmul.msk.f32.vlgmr.msra.gmra.mxu1 %vm120_vm4, %v747_v4  ;;  %1707 = vmatmul.msk.f32.vlgmr.msra.gmra.mxu2 %vm120_vm4, %v747_v4 }
 0x32c   :  { %1708 = vmatmul.msk.f32.vlgmr.msra.gmra.mxu3 %vm120_vm4, %v747_v4  ;;  %1709 = vmatmul.msk.f32.vlgmr.msra.gmra.mxu0 %vm120_vm4, %v747_v4 }
 0x32d   :  { %1113 = vmatpush.msra.mxu2 %v2124_v43  ;;  %1093 = vmatpush.msra.mxu1 %v2099_v39 }
 0x32e   :  { %1133 = vmatpush.msra.mxu3 %v2185_v53  ;;  %1153 = vmatpush.msra.mxu0 %v2137_v46 }
 0x32f   :  { %1114 = vmatpush.msra.mxu2 %v2132_v45  ;;  %1094 = vmatpush.msra.mxu1 %v2105_v40 }
 0x330   :  { %1134 = vmatpush.msra.mxu3 %v2194_v54  ;;  %1154 = vmatpush.msra.mxu0 %v2149_v48 }
 0x331   :  { %1115 = vmatpush.msra.mxu2 %v2144_v47  ;;  %1095 = vmatpush.msra.mxu1 %v2111_v41 }
 0x332   :  { %1135 = vmatpush.msra.mxu3 %v2201_v55  ;;  %1155 = vmatpush.msra.mxu0 %v2162_v50 }
 0x333   :  { %1116 = vmatpush.msra.mxu2 %v2157_v49  ;;  %1096 = vmatpush.msra.mxu1 %v2117_v42 }
 0x334   :  { %1136 = vmatpush.msra.mxu3 %v2208_v56  ;;  %1156 = vmatpush.msra.mxu0 %v2170_v51 }
 0x3a8   :  { %v767_v5 = vpop.f32.mrf.mxu1 }
 0x3a9   :  { %v834_v6 = vrot.slane %v767_v5, 2  ;;  %v827_v7 = vpop.f32.mrf.mxu0 }
 0x3aa   :  { %v837_v9 = vrot.slane %v827_v7, 2 }
 0x3ab   :  { %v842_v10 = vadd.f32 %v834_v6, %v742_v8 }
 0x3ac   :  { %v845_v12 = vadd.f32 %v837_v9, %v745_v11 }
 0x3ad   :  { %v1710_v13 = vmul.f32 -1.442695, %v842_v10 }
 0x3ae   :  { %v1712_v15 = vmul.f32 -1.442695, %v845_v12  ;;  %v787_v16 = vpop.f32.mrf.mxu2 }
 0x3af   :  { %1799 = vpow2.f32 %v1710_v13  ;;  %v835_v17 = vrot.slane %v787_v16, 2  ;;  %v807_v26 = vpop.f32.mrf.mxu3 }
 0x3b0   :  { %1801 = vpow2.f32 %v1712_v15  ;;  %v836_v30 = vrot.slane %v807_v26, 2 }
 0x3b1   :  { %v843_v42 = vadd.f32 %v835_v17, %v743_v18 }
 0x3b2   :  { %v844_v35 = vadd.f32 %v836_v30, %v744_v33 }
 0x3b3   :  { %v1711_v19 = vmul.f32 -1.442695, %v843_v42 }
 0x3b5   :  { %v1800_v20 = vpop.eup %1799  ;;  %1803 = vpow2.f32 %v1711_v19 }
 0x3b6   :  { %v1802_v21 = vpop.eup %1801  ;;  %v849_v22 = vadd.f32 1.0, %v1800_v20 }
 0x3b7   :  { %v888_v23 = vadd.f32 1.0, %v1802_v21 }
 0x3b8   :  { %1805 = vrcp.f32 %v849_v22  ;;  %v861_v44 = vand.u32 2147483648, %v849_v22  ;;  %vm855_vm12 = vweird.f32 %v849_v22  ;;  %v859_v57 = vand.u32 2147483647, %v849_v22 }
 0x3b9   :  { %1807 = vrcp.f32 %v888_v23  ;;  %v900_v12 = vand.u32 2147483648, %v888_v23  ;;  %vm894_vm5 = vweird.f32 %v888_v23  ;;  %v898_v13 = vand.u32 2147483647, %v888_v23 }
 0x3ba   :  { %v862_v0 = vor.u32 1.1754944e-38, %v861_v44  ;;  %vm860_vm0 = vcmp.eq.f32.partialorder %v859_v57, 8.507059e+37 }
 0x3bb   :  { %v1804_v24 = vpop.eup %1803  ;;  %v901_v16 = vor.u32 1.1754944e-38, %v900_v12  ;;  %vm899_vm7 = vcmp.eq.f32.partialorder %v898_v13, 8.507059e+37 }
 0x3bc   :  { %v868_v25 = vadd.f32 1.0, %v1804_v24 }
 0x3be   :  { %v1806_v27 = vpop.eup %1805  ;;  %1809 = vrcp.f32 %v868_v25  ;;  %v880_v58 = vand.u32 2147483648, %v868_v25  ;;  %v878_v62 = vand.u32 2147483647, %v868_v25  ;;  %vm874_vm15 = vweird.f32 %v868_v25 }
 0x3bf   :  { %v851_v28 = vmul.f32 %v1806_v27, %v849_v22  ;;  %v1808_v32 = vpop.eup %1807  ;;  %vm856_vm11 = vweird.f32 %v1806_v27  ;;  %1811 = vtanh.f32 %v844_v35 }
 0x3c0   :  { %v890_v38 = vmul.f32 %v1808_v32, %v888_v23  ;;  %vm857_vm13 = vmor %vm855_vm12, %vm856_vm11  ;;  %v881_v29 = vor.u32 1.1754944e-38, %v880_v58  ;;  %vm879_vm2 = vcmp.eq.f32.partialorder %v878_v62, 8.507059e+37  ;;  %vm895_vm3 = vweird.f32 %v1808_v32 }
 0x3c1   :  { %v852_v31 = vsub.f32 1.0, %v851_v28  ;;  %vm896_vm6 = vmor %vm894_vm5, %vm895_vm3  ;;  %v916_v28 = vld [vmem:[#allocation2 + $0x28] sm:$0x3] }
 0x3c2   :  { %v891_v63 = vsub.f32 1.0, %v890_v38 }
 0x3c3   :  { %v853_v34 = vmul.f32 %v1806_v27, %v852_v31 }
 0x3c4   :  { %v1810_v14 = vpop.eup %1809  ;;  %v892_v6 = vmul.f32 %v1808_v32, %v891_v63 }
 0x3c5   :  { %v870_v36 = vmul.f32 %v1810_v14, %v868_v25  ;;  %v854_v37 = vadd.f32 %v1806_v27, %v853_v34  ;;  %vm875_vm14 = vweird.f32 %v1810_v14  ;;  %v1812_v5 = vpop.eup %1811 }
 0x3c6   :  { %vm876_vm1 = vmor %vm874_vm15, %vm875_vm14  ;;  %v893_v11 = vadd.f32 %v1808_v32, %v892_v6 }
 0x3c7   :  { %v871_v52 = vsub.f32 1.0, %v870_v36  ;;  %v858_v61 = vsel %vm857_vm13, %v1806_v27, %v854_v37 }
 0x3c8   :  { %v863_v2 = vsel %vm860_vm0, %v862_v0, %v858_v61  ;;  %v897_v15 = vsel %vm896_vm6, %v1808_v32, %v893_v11 }
 0x3c9   :  { %v872_v59 = vmul.f32 %v1810_v14, %v871_v52  ;;  %v908_v9 = vmul.f32 %v1812_v5, %v863_v2  ;;  %v902_v17 = vsel %vm899_vm7, %v901_v16, %v897_v15  ;;  %v1880_v16 = vld [vmem:[%s2485_s3 + $0x68] sm:$0xff] }
 0x3cb   :  { %v873_v1 = vadd.f32 %v1810_v14, %v872_v59 }
 0x3cd   :  { %v877_v4 = vsel %vm876_vm1, %v1810_v14, %v873_v1 }
 0x3ce   :  { %v882_v7 = vsel %vm879_vm2, %v881_v29, %v877_v4 }
 0x3cf   :  { %v907_v8 = vmul.f32 %v905_v3, %v882_v7 }
 0x3d1   :  { %v2311_v10 = vadd.f32 %v908_v9, %v907_v8 }
 0x3d3   :  { %1813 = vtanh.f32 %v2311_v10  ;;  %v1065_v1 = vrot.slane %v2311_v10, 6 }
 0x3d9   :  { %v1814_v60 = vpop.eup %1813 }
 0x3da   :  { %v911_v18 = vmul.f32 %v1814_v60, %v902_v17  ;;  %v1881_v60 = vld [vmem:[%s2485_s3 + $0x60] sm:$0xff]  ;;  %v1882_v17 = vld [vmem:[%s2485_s3 + $0x70] sm:$0xff] }
 0x3dc   :  { %912 = vst [vmem:[#allocation3 - $0x3] sm:$0x40] %v911_v18  ;;  %v919_v42 = vrot.slane %v911_v18, 6 }
 0x3dd   :  { %913 = vst [vmem:[#allocation3 + $0x4] sm:$0x80] %v911_v18  ;;  %v1883_v18 = vld [vmem:[%s2485_s3 + $0x78] sm:$0xff] }
 0x3de   :  { %1713 = vmatmul.msk.f32.vlgmr.msrb.gmra.mxu1 %vm120_vm4, %v919_v42  ;;  %1714 = vmatmul.msk.f32.vlgmr.msrb.gmra.mxu2 %vm120_vm4, %v919_v42 }
 0x3df   :  { %1715 = vmatmul.msk.f32.vlgmr.msrb.gmra.mxu3 %vm120_vm4, %v919_v42  ;;  %1716 = vmatmul.msk.f32.vlgmr.msrb.gmra.mxu0 %vm120_vm4, %v919_v42  ;;  %v1884_v42 = vld [vmem:[%s2485_s3 + $0x48] sm:$0xff] }
 0x3e0   :  { %1285 = vmatpush.msrb.mxu2 %v2124_v43  ;;  %1265 = vmatpush.msrb.mxu1 %v2099_v39  ;;  %v2334_v39 = vld [vmem:[%s2485_s3] sm:$0xff] }
 0x3e1   :  { %1305 = vmatpush.msrb.mxu3 %v2185_v53  ;;  %1325 = vmatpush.msrb.mxu0 %v2137_v46 }
 0x3e2   :  { %1286 = vmatpush.msrb.mxu2 %v2132_v45  ;;  %1266 = vmatpush.msrb.mxu1 %v2105_v40  ;;  %v914_v40 = vld [vmem:[#allocation2 + $0x8] sm:$0x3]  ;;  %v917_v45 = vld [vmem:[#allocation2 + $0x38] sm:$0x3] }
 0x3e3   :  { %1306 = vmatpush.msrb.mxu3 %v2194_v54  ;;  %1326 = vmatpush.msrb.mxu0 %v2149_v48 }
 0x3e4   :  { %1287 = vmatpush.msrb.mxu2 %v2144_v47  ;;  %1267 = vmatpush.msrb.mxu1 %v2111_v41 }
 0x3e5   :  { %1307 = vmatpush.msrb.mxu3 %v2201_v55  ;;  %1327 = vmatpush.msrb.mxu0 %v2162_v50 }
 0x3e6   :  { %1288 = vmatpush.msrb.mxu2 %v2157_v49  ;;  %1268 = vmatpush.msrb.mxu1 %v2334_v39  ;;  %v915_v49 = vld [vmem:[#allocation2 + $0x20] sm:$0x3] }
 0x3e7   :  { %1308 = vmatpush.msrb.mxu3 %v2208_v56  ;;  %1328 = vmatpush.msrb.mxu0 %v2170_v51 }
 0x45b   :  { %v939_v43 = vpop.f32.mrf.mxu1 }
 0x45c   :  { %v1002_v41 = vadd.f32 %v939_v43, %v914_v40  ;;  %v999_v46 = vpop.f32.mrf.mxu0  ;;  %v1885_v40 = vld [vmem:[%s2485_s3 + $0x40] sm:$0xff]  ;;  %v1886_v43 = vld [vmem:[%s2485_s3 + $0x50] sm:$0xff] }
 0x45d   :  { %v1005_v47 = vadd.f32 %v999_v46, %v917_v45  ;;  %v1888_v45 = vld [vmem:[%s2485_s3 + $0x28] sm:$0xff]  ;;  %v1889_v46 = vld [vmem:[%s2485_s3 + $0x20] sm:$0xff] }
 0x45e   :  { %v1717_v48 = vmul.f32 -1.442695, %v1002_v41  ;;  %v1887_v41 = vld [vmem:[%s2485_s3 + $0x58] sm:$0xff] }
 0x45f   :  { %v1719_v50 = vmul.f32 -1.442695, %v1005_v47  ;;  %v1890_v47 = vld [vmem:[%s2485_s3 + $0x30] sm:$0xff] }
 0x460   :  { %1815 = vpow2.f32 %v1717_v48  ;;  %v1891_v48 = vld [vmem:[%s2485_s3 + $0x38] sm:$0xff] }
 0x461   :  { %1817 = vpow2.f32 %v1719_v50  ;;  %v959_v53 = vpop.f32.mrf.mxu2  ;;  %v1892_v50 = vld [vmem:[%s2485_s3 + $0x8] sm:$0xff] }
 0x462   :  { %v1003_v54 = vadd.f32 %v959_v53, %v915_v49  ;;  %v979_v26 = vpop.f32.mrf.mxu3  ;;  %v1893_v49 = vld [vmem:[%s2485_s3 + $0x10] sm:$0xff]  ;;  %v1894_v53 = vld [vmem:[%s2485_s3 + $0x18] sm:$0xff] }
 0x463   :  { %v1004_v32 = vadd.f32 %v979_v26, %v916_v28  ;;  %v1075_v26 = vld [vmem:[#allocation2 + $0x20] sm:$0xc] }
 0x464   :  { %v1718_v55 = vmul.f32 -1.442695, %v1003_v54 }
 0x466   :  { %v1816_v19 = vpop.eup %1815  ;;  %1819 = vpow2.f32 %v1718_v55 }
 0x467   :  { %v1818_v20 = vpop.eup %1817  ;;  %v1009_v56 = vadd.f32 1.0, %v1816_v19 }
 0x468   :  { %v1048_v51 = vadd.f32 1.0, %v1818_v20  ;;  %v1074_v20 = vld [vmem:[#allocation2 + $0x8] sm:$0xc] }
 0x469   :  { %1821 = vrcp.f32 %v1009_v56  ;;  %v1021_v35 = vand.u32 2147483648, %v1009_v56  ;;  %vm1015_vm9 = vweird.f32 %v1009_v56  ;;  %v1019_v37 = vand.u32 2147483647, %v1009_v56 }
 0x46a   :  { %1823 = vrcp.f32 %v1048_v51  ;;  %v1060_v8 = vand.u32 2147483648, %v1048_v51  ;;  %vm1054_vm1 = vweird.f32 %v1048_v51  ;;  %v1058_v9 = vand.u32 2147483647, %v1048_v51 }
 0x46b   :  { %v1022_v59 = vor.u32 1.1754944e-38, %v1021_v35  ;;  %vm1020_vm13 = vcmp.eq.f32.partialorder %v1019_v37, 8.507059e+37 }
 0x46c   :  { %v1820_v21 = vpop.eup %1819  ;;  %v1061_v12 = vor.u32 1.1754944e-38, %v1060_v8  ;;  %vm1059_vm3 = vcmp.eq.f32.partialorder %v1058_v9, 8.507059e+37 }
 0x46d   :  { %v1028_v22 = vadd.f32 1.0, %v1820_v21  ;;  %v1077_v21 = vld [vmem:[#allocation2 + $0x38] sm:$0xc] }
 0x46f   :  { %v1822_v23 = vpop.eup %1821  ;;  %1825 = vrcp.f32 %v1028_v22  ;;  %v1040_v38 = vand.u32 2147483648, %v1028_v22  ;;  %v1038_v57 = vand.u32 2147483647, %v1028_v22  ;;  %vm1034_vm12 = vweird.f32 %v1028_v22 }
 0x470   :  { %v1011_v24 = vmul.f32 %v1822_v23, %v1009_v56  ;;  %v1824_v27 = vpop.eup %1823  ;;  %vm1016_vm8 = vweird.f32 %v1822_v23  ;;  %1827 = vtanh.f32 %v1004_v32 }
 0x471   :  { %v1050_v14 = vmul.f32 %v1824_v27, %v1048_v51  ;;  %vm1017_vm10 = vmor %vm1015_vm9, %vm1016_vm8  ;;  %v1041_v62 = vor.u32 1.1754944e-38, %v1040_v38  ;;  %vm1039_vm15 = vcmp.eq.f32.partialorder %v1038_v57, 8.507059e+37  ;;  %vm1055_vm0 = vweird.f32 %v1824_v27  ;;  %v1076_v57 = vld [vmem:[#allocation2 + $0x28] sm:$0xc] }
 0x472   :  { %v1012_v25 = vsub.f32 1.0, %v1011_v24  ;;  %vm1056_vm2 = vmor %vm1054_vm1, %vm1055_vm0 }
 0x473   :  { %v1051_v58 = vsub.f32 1.0, %v1050_v14 }
 0x474   :  { %v1013_v30 = vmul.f32 %v1822_v23, %v1012_v25 }
 0x475   :  { %v1826_v31 = vpop.eup %1825  ;;  %v1052_v2 = vmul.f32 %v1824_v27, %v1051_v58 }
 0x476   :  { %v1030_v33 = vmul.f32 %v1826_v31, %v1028_v22  ;;  %v1014_v34 = vadd.f32 %v1822_v23, %v1013_v30  ;;  %vm1035_vm11 = vweird.f32 %v1826_v31  ;;  %v1828_v29 = vpop.eup %1827 }
 0x477   :  { %vm1036_vm14 = vmor %vm1034_vm12, %vm1035_vm11  ;;  %v1053_v7 = vadd.f32 %v1824_v27, %v1052_v2 }
 0x478   :  { %v1031_v36 = vsub.f32 1.0, %v1030_v33  ;;  %v1018_v52 = vsel %vm1017_vm10, %v1822_v23, %v1014_v34 }
 0x479   :  { %v1023_v63 = vsel %vm1020_vm13, %v1022_v59, %v1018_v52  ;;  %v1057_v11 = vsel %vm1056_vm2, %v1824_v27, %v1053_v7 }
 0x47a   :  { %v1032_v44 = vmul.f32 %v1826_v31, %v1031_v36  ;;  %v1068_v5 = vmul.f32 %v1828_v29, %v1023_v63  ;;  %v1062_v10 = vsel %vm1059_vm3, %v1061_v12, %v1057_v11 }
 0x47c   :  { %v1033_v61 = vadd.f32 %v1826_v31, %v1032_v44 }
 0x47e   :  { %v1037_v0 = vsel %vm1036_vm14, %v1826_v31, %v1033_v61 }
 0x47f   :  { %v1042_v3 = vsel %vm1039_vm15, %v1041_v62, %v1037_v0 }
 0x480   :  { %v1067_v4 = vmul.f32 %v1065_v1, %v1042_v3 }
 0x482   :  { %v2340_v6 = vadd.f32 %v1068_v5, %v1067_v4 }
 0x484   :  { %1829 = vtanh.f32 %v2340_v6 }
 0x48a   :  { %v1830_v13 = vpop.eup %1829 }
 0x48b   :  { %v1071_v15 = vmul.f32 %v1830_v13, %v1062_v10  ;;  %v1236_v10 = vrot.slane %v2340_v6, 6 }
 0x48d   :  { %1720 = vmatmul.msk.f32.vlgmr.msra.gmra.mxu1 %vm120_vm4, %v1071_v15  ;;  %1072 = vst [vmem:[#allocation3 + $0x4] sm:$0x1] %v1071_v15  ;;  %1721 = vmatmul.msk.f32.vlgmr.msra.gmra.mxu2 %vm120_vm4, %v1071_v15 }
 0x48e   :  { %1073 = vst [vmem:[#allocation3 + $0xb] sm:$0x2] %v1071_v15  ;;  %1722 = vmatmul.msk.f32.vlgmr.msra.gmra.mxu3 %vm120_vm4, %v1071_v15  ;;  %1723 = vmatmul.msk.f32.vlgmr.msra.gmra.mxu0 %vm120_vm4, %v1071_v15 }
 0x48f   :  { %1457 = vmatpush.msra.mxu2 %v1880_v16  ;;  %1437 = vmatpush.msra.mxu1 %v1881_v60 }
 0x490   :  { %1477 = vmatpush.msra.mxu3 %v1882_v17  ;;  %1497 = vmatpush.msra.mxu0 %v1883_v18 }
 0x491   :  { %1458 = vmatpush.msra.mxu2 %v1884_v42  ;;  %1438 = vmatpush.msra.mxu1 %v1885_v40 }
 0x492   :  { %1478 = vmatpush.msra.mxu3 %v1886_v43  ;;  %1498 = vmatpush.msra.mxu0 %v1887_v41 }
 0x493   :  { %1459 = vmatpush.msra.mxu2 %v1888_v45  ;;  %1439 = vmatpush.msra.mxu1 %v1889_v46 }
 0x494   :  { %1479 = vmatpush.msra.mxu3 %v1890_v47  ;;  %1499 = vmatpush.msra.mxu0 %v1891_v48 }
 0x495   :  { %1460 = vmatpush.msra.mxu2 %v1892_v50  ;;  %1440 = vmatpush.msra.mxu1 %v2334_v39 }
 0x496   :  { %1480 = vmatpush.msra.mxu3 %v1893_v49  ;;  %1500 = vmatpush.msra.mxu0 %v1894_v53 }
 0x50a   :  { %v1098_v54 = vpop.f32.mrf.mxu1 }
 0x50b   :  { %v1165_v55 = vrot.slane %v1098_v54, 6  ;;  %v1158_v19 = vpop.f32.mrf.mxu0 }
 0x50c   :  { %v1168_v56 = vrot.slane %v1158_v19, 6  ;;  %v1245_v19 = vld [vmem:[#allocation2 + $0x8] sm:$0x30] }
 0x50d   :  { %v1173_v51 = vadd.f32 %v1165_v55, %v1074_v20 }
 0x50e   :  { %v1176_v22 = vadd.f32 %v1168_v56, %v1077_v21 }
 0x50f   :  { %v1724_v23 = vmul.f32 -1.442695, %v1173_v51  ;;  %v1248_v51 = vld [vmem:[#allocation2 + $0x38] sm:$0x30] }
 0x510   :  { %v1726_v39 = vmul.f32 -1.442695, %v1176_v22  ;;  %v1118_v24 = vpop.f32.mrf.mxu2 }
 0x511   :  { %1831 = vpow2.f32 %v1724_v23  ;;  %v1166_v25 = vrot.slane %v1118_v24, 6  ;;  %v1138_v35 = vpop.f32.mrf.mxu3 }
 0x512   :  { %1833 = vpow2.f32 %v1726_v39  ;;  %v1167_v38 = vrot.slane %v1138_v35, 6 }
 0x513   :  { %v1174_v27 = vadd.f32 %v1166_v25, %v1075_v26  ;;  %v1246_v25 = vld [vmem:[#allocation2 + $0x20] sm:$0x30] }
 0x514   :  { %v1175_v61 = vadd.f32 %v1167_v38, %v1076_v57 }
 0x515   :  { %v1725_v28 = vmul.f32 -1.442695, %v1174_v27 }
 0x517   :  { %v1832_v30 = vpop.eup %1831  ;;  %1835 = vpow2.f32 %v1725_v28 }
 0x518   :  { %v1834_v31 = vpop.eup %1833  ;;  %v1180_v32 = vadd.f32 1.0, %v1832_v30 }
 0x519   :  { %v1219_v33 = vadd.f32 1.0, %v1834_v31 }
 0x51a   :  { %1837 = vrcp.f32 %v1180_v32  ;;  %v1192_v1 = vand.u32 2147483648, %v1180_v32  ;;  %vm1186_vm6 = vweird.f32 %v1180_v32  ;;  %v1190_v2 = vand.u32 2147483647, %v1180_v32 }
 0x51b   :  { %1839 = vrcp.f32 %v1219_v33  ;;  %v1231_v41 = vand.u32 2147483648, %v1219_v33  ;;  %vm1225_vm14 = vweird.f32 %v1219_v33  ;;  %v1229_v45 = vand.u32 2147483647, %v1219_v33 }
 0x51c   :  { %v1193_v9 = vor.u32 1.1754944e-38, %v1192_v1  ;;  %vm1191_vm10 = vcmp.eq.f32.partialorder %v1190_v2, 8.507059e+37 }
 0x51d   :  { %v1836_v34 = vpop.eup %1835  ;;  %v1232_v47 = vor.u32 1.1754944e-38, %v1231_v41  ;;  %vm1230_vm0 = vcmp.eq.f32.partialorder %v1229_v45, 8.507059e+37 }
 0x51e   :  { %v1199_v14 = vadd.f32 1.0, %v1836_v34 }
 0x520   :  { %v1838_v36 = vpop.eup %1837  ;;  %1841 = vrcp.f32 %v1199_v14  ;;  %v1211_v3 = vand.u32 2147483648, %v1199_v14  ;;  %v1209_v7 = vand.u32 2147483647, %v1199_v14  ;;  %vm1205_vm9 = vweird.f32 %v1199_v14 }
 0x521   :  { %v1182_v37 = vmul.f32 %v1838_v36, %v1180_v32  ;;  %v1840_v52 = vpop.eup %1839  ;;  %vm1187_vm5 = vweird.f32 %v1838_v36  ;;  %1843 = vtanh.f32 %v1175_v61 }
 0x522   :  { %v1221_v0 = vmul.f32 %v1840_v52, %v1219_v33  ;;  %vm1188_vm7 = vmor %vm1186_vm6, %vm1187_vm5  ;;  %v1212_v12 = vor.u32 1.1754944e-38, %v1211_v3  ;;  %vm1210_vm12 = vcmp.eq.f32.partialorder %v1209_v7, 8.507059e+37  ;;  %vm1226_vm13 = vweird.f32 %v1840_v52 }
 0x523   :  { %v1183_v44 = vsub.f32 1.0, %v1182_v37  ;;  %vm1227_vm15 = vmor %vm1225_vm14, %vm1226_vm13 }
 0x524   :  { %v1222_v8 = vsub.f32 1.0, %v1221_v0 }
 0x525   :  { %v1184_v58 = vmul.f32 %v1838_v36, %v1183_v44 }
 0x526   :  { %v1842_v59 = vpop.eup %1841  ;;  %v1223_v60 = vmul.f32 %v1840_v52, %v1222_v8 }
 0x527   :  { %v1201_v62 = vmul.f32 %v1842_v59, %v1199_v14  ;;  %v1185_v63 = vadd.f32 %v1838_v36, %v1184_v58  ;;  %vm1206_vm8 = vweird.f32 %v1842_v59  ;;  %v1844_v16 = vpop.eup %1843 }
 0x528   :  { %vm1207_vm11 = vmor %vm1205_vm9, %vm1206_vm8  ;;  %v1224_v43 = vadd.f32 %v1840_v52, %v1223_v60 }
 0x529   :  { %v1202_v29 = vsub.f32 1.0, %v1201_v62  ;;  %v1189_v5 = vsel %vm1188_vm7, %v1838_v36, %v1185_v63 }
 0x52a   :  { %v1194_v13 = vsel %vm1191_vm10, %v1193_v9, %v1189_v5  ;;  %v1228_v46 = vsel %vm1227_vm15, %v1840_v52, %v1224_v43  ;;  %v1247_v52 = vld [vmem:[#allocation2 + $0x28] sm:$0x30] }
 0x52b   :  { %v1203_v4 = vmul.f32 %v1842_v59, %v1202_v29  ;;  %v1239_v42 = vmul.f32 %v1844_v16, %v1194_v13  ;;  %v1233_v48 = vsel %vm1230_vm0, %v1232_v47, %v1228_v46 }
 0x52d   :  { %v1204_v11 = vadd.f32 %v1842_v59, %v1203_v4 }
 0x52f   :  { %v1208_v15 = vsel %vm1207_vm11, %v1842_v59, %v1204_v11 }
 0x530   :  { %v1213_v17 = vsel %vm1210_vm12, %v1212_v12, %v1208_v15 }
 0x531   :  { %v1238_v18 = vmul.f32 %v1236_v10, %v1213_v17 }
 0x533   :  { %v2394_v40 = vadd.f32 %v1239_v42, %v1238_v18 }
 0x535   :  { %1845 = vtanh.f32 %v2394_v40  ;;  %v1408_v13 = vrot.slane %v2394_v40, 6 }
 0x53b   :  { %v1846_v6 = vpop.eup %1845 }
 0x53c   :  { %v1242_v50 = vmul.f32 %v1846_v6, %v1233_v48 }
 0x53e   :  { %1243 = vst [vmem:[#allocation3 + $0x3] sm:$0x4] %v1242_v50  ;;  %v1250_v49 = vrot.slane %v1242_v50, 2 }
 0x53f   :  { %1244 = vst [vmem:[#allocation3 + $0xa] sm:$0x8] %v1242_v50 }
 0x540   :  { %1727 = vmatmul.msk.f32.vlgmr.msrb.gmra.mxu1 %vm120_vm4, %v1250_v49  ;;  %1728 = vmatmul.msk.f32.vlgmr.msrb.gmra.mxu2 %vm120_vm4, %v1250_v49 }
 0x541   :  { %1729 = vmatmul.msk.f32.vlgmr.msrb.gmra.mxu3 %vm120_vm4, %v1250_v49  ;;  %1730 = vmatmul.msk.f32.vlgmr.msrb.gmra.mxu0 %vm120_vm4, %v1250_v49  ;;  %v1606_v49 = vld [vmem:[%s2487_s5 + $0x78] sm:$0xff] }
 0x542   :  { %1611 = vmatpush.msrb.mxu1 %v1606_v49 }
 0x5bd   :  { %v1270_v53 = vpop.f32.mrf.mxu1 }
 0x5be   :  { %v1337_v54 = vrot.slane %v1270_v53, 4  ;;  %v1330_v55 = vpop.f32.mrf.mxu0 }
 0x5bf   :  { %v1340_v20 = vrot.slane %v1330_v55, 4 }
 0x5c0   :  { %v1345_v56 = vadd.f32 %v1337_v54, %v1245_v19  ;;  %v1605_v54 = vld [vmem:[%s2487_s5 + $0x70] sm:$0xff] }
 0x5c1   :  { %v1348_v21 = vadd.f32 %v1340_v20, %v1248_v51  ;;  %1612 = vmatpush.msrb.mxu1 %v1605_v54  ;;  %v1417_v20 = vld [vmem:[#allocation2 + $0x8] sm:$0xc0] }
 0x5c2   :  { %v1731_v22 = vmul.f32 -1.442695, %v1345_v56  ;;  %v1604_v51 = vld [vmem:[%s2487_s5 + $0x68] sm:$0xff] }
 0x5c3   :  { %v1733_v23 = vmul.f32 -1.442695, %v1348_v21  ;;  %v1290_v39 = vpop.f32.mrf.mxu2  ;;  %1613 = vmatpush.msrb.mxu1 %v1604_v51 }
 0x5c4   :  { %1847 = vpow2.f32 %v1731_v22  ;;  %v1338_v24 = vrot.slane %v1290_v39, 4  ;;  %v1310_v14 = vpop.f32.mrf.mxu3  ;;  %v1420_v22 = vld [vmem:[#allocation2 + $0x38] sm:$0xc0]  ;;  %v1603_v39 = vld [vmem:[%s2487_s5 + $0x60] sm:$0xff] }
 0x5c5   :  { %1849 = vpow2.f32 %v1733_v23  ;;  %v1339_v37 = vrot.slane %v1310_v14, 4  ;;  %1614 = vmatpush.msrb.mxu1 %v1603_v39  ;;  %v1599_v14 = vld [vmem:[%s2487_s5 + $0x40] sm:$0xff] }
 0x5c6   :  { %v1346_v26 = vadd.f32 %v1338_v24, %v1246_v25 }
 0x5c7   :  { %v1347_v59 = vadd.f32 %v1339_v37, %v1247_v52 }
 0x5c8   :  { %v1732_v27 = vmul.f32 -1.442695, %v1346_v26 }
 0x5ca   :  { %v1848_v28 = vpop.eup %1847  ;;  %1851 = vpow2.f32 %v1732_v27  ;;  %v1602_v27 = vld [vmem:[%s2487_s5 + $0x58] sm:$0xff] }
 0x5cb   :  { %v1850_v30 = vpop.eup %1849  ;;  %v1352_v31 = vadd.f32 1.0, %v1848_v28  ;;  %1615 = vmatpush.msrb.mxu1 %v1602_v27 }
 0x5cc   :  { %v1391_v32 = vadd.f32 1.0, %v1850_v30  ;;  %v1418_v30 = vld [vmem:[#allocation2 + $0x20] sm:$0xc0] }
 0x5cd   :  { %1853 = vrcp.f32 %v1352_v31  ;;  %v1364_v0 = vand.u32 2147483648, %v1352_v31  ;;  %vm1358_vm2 = vweird.f32 %v1352_v31  ;;  %v1362_v29 = vand.u32 2147483647, %v1352_v31 }
 0x5ce   :  { %1855 = vrcp.f32 %v1391_v32  ;;  %v1403_v41 = vand.u32 2147483648, %v1391_v32  ;;  %vm1397_vm11 = vweird.f32 %v1391_v32  ;;  %v1401_v45 = vand.u32 2147483647, %v1391_v32 }
 0x5cf   :  { %v1365_v8 = vor.u32 1.1754944e-38, %v1364_v0  ;;  %vm1363_vm7 = vcmp.eq.f32.partialorder %v1362_v29, 8.507059e+37 }
 0x5d0   :  { %v1852_v33 = vpop.eup %1851  ;;  %v1404_v47 = vor.u32 1.1754944e-38, %v1403_v41  ;;  %vm1402_vm13 = vcmp.eq.f32.partialorder %v1401_v45, 8.507059e+37 }
 0x5d1   :  { %v1371_v34 = vadd.f32 1.0, %v1852_v33  ;;  %v1600_v33 = vld [vmem:[%s2487_s5 + $0x48] sm:$0xff] }
 0x5d3   :  { %v1854_v35 = vpop.eup %1853  ;;  %1857 = vrcp.f32 %v1371_v34  ;;  %v1383_v2 = vand.u32 2147483648, %v1371_v34  ;;  %v1381_v5 = vand.u32 2147483647, %v1371_v34  ;;  %vm1377_vm6 = vweird.f32 %v1371_v34 }
 0x5d4   :  { %v1354_v36 = vmul.f32 %v1854_v35, %v1352_v31  ;;  %v1856_v44 = vpop.eup %1855  ;;  %vm1359_vm1 = vweird.f32 %v1854_v35  ;;  %1859 = vtanh.f32 %v1347_v59  ;;  %v1601_v31 = vld [vmem:[%s2487_s5 + $0x50] sm:$0xff] }
 0x5d5   :  { %v1393_v63 = vmul.f32 %v1856_v44, %v1391_v32  ;;  %vm1360_vm3 = vmor %vm1358_vm2, %vm1359_vm1  ;;  %v1384_v11 = vor.u32 1.1754944e-38, %v1383_v2  ;;  %vm1382_vm9 = vcmp.eq.f32.partialorder %v1381_v5, 8.507059e+37  ;;  %vm1398_vm10 = vweird.f32 %v1856_v44  ;;  %1616 = vmatpush.msrb.mxu1 %v1601_v31  ;;  %v1591_v5 = vld [vmem:[%s2487_s5] sm:$0xff] }
 0x5d6   :  { %v1355_v38 = vsub.f32 1.0, %v1354_v36  ;;  %vm1399_vm12 = vmor %vm1397_vm11, %vm1398_vm10  ;;  %vm1634_vm11 = vcmask 31744  }
 0x5d7   :  { %v1394_v7 = vsub.f32 1.0, %v1393_v63  ;;  %1617 = vmatpush.msrb.mxu1 %v1600_v33  ;;  %v1594_v63 = vld [vmem:[%s2487_s5 + $0x18] sm:$0xff] }
 0x5d8   :  { %v1356_v57 = vmul.f32 %v1854_v35, %v1355_v38  ;;  %v1598_v38 = vld [vmem:[%s2487_s5 + $0x38] sm:$0xff] }
 0x5d9   :  { %v1858_v58 = vpop.eup %1857  ;;  %v1395_v16 = vmul.f32 %v1856_v44, %v1394_v7  ;;  %1618 = vmatpush.msrb.mxu1 %v1599_v14 }
 0x5da   :  { %v1373_v61 = vmul.f32 %v1858_v58, %v1371_v34  ;;  %v1357_v62 = vadd.f32 %v1854_v35, %v1356_v57  ;;  %vm1378_vm5 = vweird.f32 %v1858_v58  ;;  %v1860_v15 = vpop.eup %1859  ;;  %v1596_v57 = vld [vmem:[%s2487_s5 + $0x28] sm:$0xff] }
 0x5db   :  { %vm1379_vm8 = vmor %vm1377_vm6, %vm1378_vm5  ;;  %v1396_v43 = vadd.f32 %v1856_v44, %v1395_v16  ;;  %1619 = vmatpush.msrb.mxu1 %v1598_v38  ;;  %vm1637_vm6 = vcmask 261126  }
 0x5dc   :  { %v1374_v1 = vsub.f32 1.0, %v1373_v61  ;;  %v1361_v4 = vsel %vm1360_vm3, %v1854_v35, %v1357_v62  ;;  %v1595_v61 = vld [vmem:[%s2487_s5 + $0x20] sm:$0xff] }
 0x5dd   :  { %v1366_v12 = vsel %vm1363_vm7, %v1365_v8, %v1361_v4  ;;  %v1400_v46 = vsel %vm1399_vm12, %v1856_v44, %v1396_v43  ;;  %v1597_v44 = vld [vmem:[%s2487_s5 + $0x30] sm:$0xff]  ;;  %v1419_v8 = vld [vmem:[#allocation2 + $0x28] sm:$0xc0] }
 0x5de   :  { %v1375_v3 = vmul.f32 %v1858_v58, %v1374_v1  ;;  %v1411_v18 = vmul.f32 %v1860_v15, %v1366_v12  ;;  %v1405_v6 = vsel %vm1402_vm13, %v1404_v47, %v1400_v46  ;;  %1620 = vmatpush.msrb.mxu1 %v1597_v44  ;;  %v1593_v1 = vld [vmem:[%s2487_s5 + $0x10] sm:$0xff] }
 0x5e0   :  { %v1376_v9 = vadd.f32 %v1858_v58, %v1375_v3  ;;  %1621 = vmatpush.msrb.mxu1 %v1596_v57  ;;  %v1592_v3 = vld [vmem:[%s2487_s5 + $0x8] sm:$0xff]  ;;  %s1949_s5 = smov [#allocation4]  }
 0x5e1   :  { %s1647_s23 = sshll.u32 %s1949_s5, 4  ;;  %s1648_s23 = int_to_ptr.vmem [resolvable:$true] %s1647_s23 }
 0x5e2   :  { %v1380_v10 = vsel %vm1379_vm8, %v1858_v58, %v1376_v9  ;;  %1622 = vmatpush.msrb.mxu1 %v1595_v61 }
 0x5e3   :  { %v1385_v60 = vsel %vm1382_vm9, %v1384_v11, %v1380_v10 }
 0x5e4   :  { %v1410_v17 = vmul.f32 %v1408_v13, %v1385_v60  ;;  %1623 = vmatpush.msrb.mxu1 %v1594_v63 }
 0x5e6   :  { %v2402_v42 = vadd.f32 %v1411_v18, %v1410_v17  ;;  %1624 = vmatpush.msrb.mxu1 %v1593_v1 }
 0x5e8   :  { %1861 = vtanh.f32 %v2402_v42  ;;  %1625 = vmatpush.msrb.mxu1 %v1592_v3 }
 0x5ea   :  { %1626 = vmatpush.msrb.mxu1 %v1591_v5 }
 0x5ee   :  { %v1862_v40 = vpop.eup %1861 }
 0x5ef   :  { %v1414_v48 = vmul.f32 %v1862_v40, %v1405_v6 }
 0x5f1   :  { %1415 = vst [vmem:[#allocation3 + $0x2] sm:$0x10] %v1414_v48  ;;  %v1422_v50 = vrot.slane %v1414_v48, 4 }
 0x5f2   :  { %1416 = vst [vmem:[#allocation3 + $0x9] sm:$0x20] %v1414_v48 }
 0x5f3   :  { %1734 = vmatmul.msk.f32.vlgmr.msra.gmra.mxu1 %vm120_vm4, %v1422_v50  ;;  %1735 = vmatmul.msk.f32.vlgmr.msra.gmra.mxu2 %vm120_vm4, %v1422_v50 }
 0x5f4   :  { %1736 = vmatmul.msk.f32.vlgmr.msra.gmra.mxu3 %vm120_vm4, %v1422_v50  ;;  %1737 = vmatmul.msk.f32.vlgmr.msra.gmra.mxu0 %vm120_vm4, %v1422_v50  ;;  %v1580_v50 = vrot.slane %v2402_v42, 6 }
 0x670   :  { %v1442_v53 = vpop.f32.mrf.mxu1 }
 0x671   :  { %v1509_v55 = vrot.slane %v1442_v53, 2  ;;  %v1502_v19 = vpop.f32.mrf.mxu0 }
 0x672   :  { %v1512_v56 = vrot.slane %v1502_v19, 2 }
 0x673   :  { %v1517_v21 = vadd.f32 %v1509_v55, %v1417_v20 }
 0x674   :  { %v1520_v23 = vadd.f32 %v1512_v56, %v1420_v22 }
 0x675   :  { %v1738_v24 = vmul.f32 -1.442695, %v1517_v21 }
 0x676   :  { %v1740_v25 = vmul.f32 -1.442695, %v1520_v23  ;;  %v1462_v26 = vpop.f32.mrf.mxu2 }
 0x677   :  { %1863 = vpow2.f32 %v1738_v24  ;;  %v1510_v28 = vrot.slane %v1462_v26, 2  ;;  %v1482_v62 = vpop.f32.mrf.mxu3 }
 0x678   :  { %1865 = vpow2.f32 %v1740_v25  ;;  %v1511_v2 = vrot.slane %v1482_v62, 2 }
 0x679   :  { %v1518_v32 = vadd.f32 %v1510_v28, %v1418_v30  ;;  %v1750_v28 = vld [vmem:[%s2488_s6] ss:$0 sm:$0xff] }
 0x67a   :  { %v1519_v12 = vadd.f32 %v1511_v2, %v1419_v8 }
 0x67b   :  { %v1739_v34 = vmul.f32 -1.442695, %v1518_v32 }
 0x67d   :  { %v1864_v35 = vpop.eup %1863  ;;  %1867 = vpow2.f32 %v1739_v34 }
 0x67e   :  { %v1866_v36 = vpop.eup %1865  ;;  %v1524_v37 = vadd.f32 1.0, %v1864_v35 }
 0x67f   :  { %v2439_v52 = vadd.f32 1.0, %v1866_v36 }
 0x680   :  { %1869 = vrcp.f32 %v1524_v37  ;;  %v1536_v16 = vand.u32 2147483648, %v1524_v37  ;;  %vm1530_vm14 = vweird.f32 %v1524_v37  ;;  %v1534_v17 = vand.u32 2147483647, %v1524_v37 }
 0x681   :  { %1871 = vrcp.f32 %v2439_v52  ;;  %v1575_v21 = vand.u32 2147483648, %v2439_v52  ;;  %vm1569_vm8 = vweird.f32 %v2439_v52  ;;  %v1573_v42 = vand.u32 2147483647, %v2439_v52 }
 0x682   :  { %v1537_v47 = vor.u32 1.1754944e-38, %v1536_v16  ;;  %vm1535_vm2 = vcmp.eq.f32.partialorder %v1534_v17, 8.507059e+37 }
 0x683   :  { %v1868_v58 = vpop.eup %1867  ;;  %v1576_v23 = vor.u32 1.1754944e-38, %v1575_v21  ;;  %vm1574_vm10 = vcmp.eq.f32.partialorder %v1573_v42, 8.507059e+37 }
 0x684   :  { %v1543_v59 = vadd.f32 1.0, %v1868_v58 }
 0x686   :  { %v1870_v0 = vpop.eup %1869  ;;  %1873 = vrcp.f32 %v1543_v59  ;;  %v1555_v18 = vand.u32 2147483648, %v1543_v59  ;;  %v1553_v45 = vand.u32 2147483647, %v1543_v59  ;;  %vm1549_vm1 = vweird.f32 %v1543_v59 }
 0x687   :  { %v1526_v29 = vmul.f32 %v1870_v0, %v1524_v37  ;;  %v1872_v7 = vpop.eup %1871  ;;  %vm1531_vm4 = vweird.f32 %v1870_v0  ;;  %1875 = vtanh.f32 %v1519_v12 }
 0x688   :  { %v1565_v15 = vmul.f32 %v1872_v7, %v2439_v52  ;;  %vm1532_vm15 = vmor %vm1530_vm14, %vm1531_vm4  ;;  %v1556_v6 = vor.u32 1.1754944e-38, %v1555_v18  ;;  %vm1554_vm5 = vcmp.eq.f32.partialorder %v1553_v45, 8.507059e+37  ;;  %vm1570_vm7 = vweird.f32 %v1872_v7 }
 0x689   :  { %v1527_v4 = vsub.f32 1.0, %v1526_v29  ;;  %vm1571_vm9 = vmor %vm1569_vm8, %vm1570_vm7 }
 0x68a   :  { %v1566_v46 = vsub.f32 1.0, %v1565_v15 }
 0x68b   :  { %v1528_v9 = vmul.f32 %v1870_v0, %v1527_v4 }
 0x68c   :  { %v1874_v11 = vpop.eup %1873  ;;  %v1567_v54 = vmul.f32 %v1872_v7, %v1566_v46 }
 0x68d   :  { %v1545_v13 = vmul.f32 %v1874_v11, %v1543_v59  ;;  %v1529_v10 = vadd.f32 %v1870_v0, %v1528_v9  ;;  %vm1550_vm0 = vweird.f32 %v1874_v11  ;;  %v1876_v53 = vpop.eup %1875 }
 0x68e   :  { %vm1551_vm3 = vmor %vm1549_vm1, %vm1550_vm0  ;;  %v1568_v51 = vadd.f32 %v1872_v7, %v1567_v54 }
 0x68f   :  { %v1546_v60 = vsub.f32 1.0, %v1545_v13  ;;  %v1533_v41 = vsel %vm1532_vm15, %v1870_v0, %v1529_v10 }
 0x690   :  { %v1538_v48 = vsel %vm1535_vm2, %v1537_v47, %v1533_v41  ;;  %v1572_v22 = vsel %vm1571_vm9, %v1872_v7, %v1568_v51 }
 0x691   :  { %v1547_v43 = vmul.f32 %v1874_v11, %v1546_v60  ;;  %v1583_v20 = vmul.f32 %v1876_v53, %v1538_v48  ;;  %v1577_v24 = vsel %vm1574_vm10, %v1576_v23, %v1572_v22 }
 0x693   :  { %v1548_v40 = vadd.f32 %v1874_v11, %v1547_v43 }
 0x695   :  { %v1552_v49 = vsel %vm1551_vm3, %v1874_v11, %v1548_v40 }
 0x696   :  { %v1557_v55 = vsel %vm1554_vm5, %v1556_v6, %v1552_v49 }
 0x697   :  { %v1582_v19 = vmul.f32 %v1580_v50, %v1557_v55 }
 0x699   :  { %v1584_v56 = vadd.f32 %v1583_v20, %v1582_v19 }
 0x69b   :  { %1877 = vtanh.f32 %v1584_v56  ;;  %1639 = vst.msk [vmem:[#allocation6 - $0x6] sm:$0xc0] %vm1637_vm6, %v1584_v56 }
 0x69c   :  { %1663 = dma.vmem_to_hbm [thread:$0]  %s1659_s27, 32, %s1661_s30, [#allocation7]  }
 0x6a1   :  { %v1878_v39 = vpop.eup %1877 }
 0x6a2   :  { %v1586_v25 = vmul.f32 %v1878_v39, %v1577_v24 }
 0x6a4   :  { %1587 = vst [vmem:[#allocation3 + $0x1] sm:$0x40] %v1586_v25 }
 0x6a5   :  { %1588 = vst [vmem:[#allocation3 + $0x8] sm:$0x80] %v1586_v25 }
 0x6a6   :  { %1638 = vst.msk [vmem:[#allocation4 - $0x6] sm:$0xc0] %vm1637_vm6, %v1586_v25 }
 0x6a7   :  { %1652 = dma.vmem_to_hbm [thread:$0]  %s1648_s23, 32, %s1650_s25, [#allocation5]  }
 0x6ab   :  { %v1589_v26 = vld [vmem:[#allocation3] sm:$0xff] }
 0x6ac   :  { %1627 = vmatmul.f32.vlgmr.msrb.gmra.mxu1 %v1589_v26  ;;  %v1590_v27 = vld [vmem:[#allocation3 + $0x8] sm:$0xff] }
 0x6b4   :  { %1630 = vmatmul.f32.gmra.mxu1 %v1590_v27 }
 0x729   :  { %v1628_v30 = vpop.f32.mrf.mxu1 }
 0x72a   :  { %v1629_v31 = vadd.f32 %v1750_v28, %v1628_v30 }
 0x72c   :  { %1635 = vst.msk [vmem:[%s2489_s7] sm:$0xff] %vm1634_vm11, %v1629_v31 }
 0x731   :  { %v1631_v32 = vpop.f32.mrf.mxu1 }
 0x732   :  { %v1632_v33 = vadd.f32 %v1750_v28, %v1631_v32 }
 0x734   :  { %1636 = vst.msk [vmem:[%s2489_s7 + $0x8] sm:$0xff] %vm1634_vm11, %v1632_v33 }
 0x735   :  { %1943 = dma.done.wait [#allocation5], 32  }
 0x736   :  { %1944 = vsyncadd [#allocation5], 4294967264 }
 0x737   :  { %1945 = dma.done.wait [#allocation7], 32  }
 0x738   :  { %1946 = vsyncadd [#allocation7], 4294967264 }
 0x739   :  { %1674 = vsyncpa [#allocation5], 1 }
 0x73a   :  { %1675 = vsyncpa [#allocation7], 1 }

</bundles_post_ra>
